<compile_context>
chip_gen: v6e
topology: v6e:2x2x1
jax: 0.10.0
libtpu: 0.0.40
codegen_flags: <defaults>
</compile_context>

<pallas_src>
import functools
import math

import jax
import jax.numpy as jnp
from jax import lax
from jax.experimental import pallas as pl
from jax.experimental.pallas import tpu as pltpu


# ------------------------------ fused kernel --------------------------------

def _lstm_fused_kernel(x_ref, wih_ref, whh_ref, b_ref, o_ref,
                       gx_scr, h_scr, c_scr, *, mxu_dtype):
    """One bn-tile: hoisted input projection + full LSTM recurrence in VMEM.

    x_ref  : (T, bn, C)   f32   input sequence tile
    wih_ref: (C, 4H)      bf16  input->gates weights (pre-transposed)
    whh_ref: (H, 4H)      bf16  hidden->gates weights (pre-transposed)
    b_ref  : (1, 4H)      f32   b_ih + b_hh
    o_ref  : (bn, T*H)    f32   lane-dense hidden-state output block
    gx_scr : (T, bn, 4H)  f32   hoisted input projection (VMEM scratch)
    h_scr  : (bn, H)      f32   hidden state
    c_scr  : (bn, H)      f32   cell state
    Gate order follows PyTorch: [i, f, g, o].
    """
    T = x_ref.shape[0]
    C = x_ref.shape[2]
    H = h_scr.shape[-1]
    G = 4 * H

    bias = b_ref[...]                                   # (1, 4H) f32

    # Keep small weights resident in vregs; stream from VMEM when large
    # (the vreg file is only 64 x 4 KiB).
    hoist = (C * G + H * G) * jnp.dtype(mxu_dtype).itemsize <= 64 * 1024
    if hoist:
        wih = wih_ref[...]
        whh = whh_ref[...]

    # --- (1) hoisted input projection: all T matmuls off the serial path ----
    # TODO(synk): for very long T, chunk the time axis onto a second
    # ("arbitrary") grid dimension instead of a fully unrolled static loop.
    for t in range(T):
        w = wih if hoist else wih_ref[...]
        xt = x_ref[t].astype(mxu_dtype)                 # (bn, C)
        gx_scr[t] = jnp.dot(xt, w, preferred_element_type=jnp.float32) + bias

    # --- (2) serial recurrence: only h @ W_hh per step remains on the MXU ---
    h_scr[...] = jnp.zeros_like(h_scr)
    c_scr[...] = jnp.zeros_like(c_scr)
    for t in range(T):
        w = whh if hoist else whh_ref[...]
        gates = gx_scr[t] + jnp.dot(h_scr[...].astype(mxu_dtype), w,
                                    preferred_element_type=jnp.float32)
        i_g = jax.nn.sigmoid(gates[:, 0 * H:1 * H])
        f_g = jax.nn.sigmoid(gates[:, 1 * H:2 * H])
        g_g = jnp.tanh(gates[:, 2 * H:3 * H])
        o_g = jax.nn.sigmoid(gates[:, 3 * H:4 * H])
        c_new = f_g * c_scr[...] + i_g * g_g
        h_new = o_g * jnp.tanh(c_new)
        c_scr[...] = c_new
        h_scr[...] = h_new
        # Static lane slice into the lane-dense (bn, T*H) output block; the
        # whole block is written back to HBM with one unmasked DMA.
        o_ref[:, t * H:(t + 1) * H] = h_new.astype(o_ref.dtype)


# ----------------------------- tiling helpers --------------------------------

def _round_down8(v):
    return max(8, (v // 8) * 8)


def _vmem_bytes(bn, T, C, H, wbytes):
    """Rough resident-VMEM estimate for one bn-tile (incl. double buffers)."""
    G = 4 * H
    x_blk = 2 * T * bn * C * 4          # double-buffered input block
    out_blk = 2 * bn * T * H * 4        # double-buffered output block
    gx = T * bn * G * 4                 # projection scratch
    state = 2 * bn * H * 4              # h, c
    weights = 2 * ((C + H) * G * wbytes + G * 4)
    return x_blk + out_blk + gx + state + weights


def _pick_bn_tile(BN, T, C, H, wbytes, budget=24 << 20):
    """Largest multiple-of-8 tile under the VMEM budget; >=2 grid steps when
    BN >= 16 so v7x's two TensorCores both get a share of the batch."""
    cap = _round_down8(BN // 2) if BN >= 16 else _round_down8(BN)
    tile = min(256, cap)                # cap M; bigger tiles mostly add vreg pressure
    while tile > 8 and _vmem_bytes(tile, T, C, H, wbytes) > budget:
        tile -= 8
    num = -(-BN // tile)
    return tile, num


# ------------------------------- LSTM wrapper --------------------------------

def lstm_pallas(x_seq, w_ih, w_hh, b_ih, b_hh, *, mxu_dtype=jnp.bfloat16):
    """x_seq: (T, BN, C) f32; PyTorch-layout weights:
       w_ih: (4H, C), w_hh: (4H, H), b_ih/b_hh: (4H,).
       Returns (BN, T*H) f32 with element [bn, t*H + h] = h_t[bn, h]."""
    T, BN, C = x_seq.shape
    H = w_hh.shape[1]
    G = 4 * H

    wih_t = jnp.transpose(w_ih).astype(mxu_dtype)                 # (C, 4H)
    whh_t = jnp.transpose(w_hh).astype(mxu_dtype)                 # (H, 4H)
    bias = (b_ih + b_hh).astype(jnp.float32).reshape(1, G)        # (1, 4H)

    wbytes = jnp.dtype(mxu_dtype).itemsize
    bn_tile, num_bn = _pick_bn_tile(BN, T, C, H, wbytes)
    BN_pad = bn_tile * num_bn

    x = x_seq.astype(jnp.float32)
    if BN_pad != BN:
        # Pad the batch so every block is full (no OOB reads / giant fallback
        # blocks); padded rows are dropped after the call.
        x = jnp.pad(x, ((0, 0), (0, BN_pad - BN), (0, 0)))

    est = _vmem_bytes(bn_tile, T, C, H, wbytes)
    vmem_limit = int(min(max(2 * est, 32 << 20), 64 << 20))       # v7x-safe cap

    kernel = functools.partial(_lstm_fused_kernel, mxu_dtype=mxu_dtype)

    out2d = pl.pallas_call(
        kernel,
        out_shape=jax.ShapeDtypeStruct((BN_pad, T * H), jnp.float32),
        grid_spec=pltpu.PrefetchScalarGridSpec(
            num_scalar_prefetch=0,
            grid=(num_bn,),
            in_specs=[
                pl.BlockSpec((T, bn_tile, C), lambda b: (0, b, 0)),
                pl.BlockSpec((C, G), lambda b: (0, 0)),
                pl.BlockSpec((H, G), lambda b: (0, 0)),
                pl.BlockSpec((1, G), lambda b: (0, 0)),
            ],
            out_specs=pl.BlockSpec((bn_tile, T * H), lambda b: (b, 0)),
            scratch_shapes=[
                pltpu.VMEM((T, bn_tile, G), jnp.float32),   # gx
                pltpu.VMEM((bn_tile, H), jnp.float32),      # h
                pltpu.VMEM((bn_tile, H), jnp.float32),      # c
            ],
        ),
        compiler_params=pltpu.CompilerParams(
            dimension_semantics=("parallel",),
            vmem_limit_bytes=vmem_limit),
    )(x, wih_t, whh_t, bias)

    return out2d[:BN]


def temporal_embedding_forward(inp, w_ih, w_hh, b_ih, b_hh):
    """Full TemporalEmbedding.forward.  inp: (B, C, N, T) -> (B, C, N, T)."""
    B, C, N, T = inp.shape
    H = C
    # permute(3,0,2,1) -> (T, B, N, C) -> reshape (T, B*N, C)
    # TODO(synk): fold this input permute into the kernel's in_spec (read
    # (nb, C, N, T) tiles and transpose in-kernel) to drop the HBM round trip.
    x = jnp.transpose(inp, (3, 0, 2, 1)).reshape(T, B * N, C)
    y2d = lstm_pallas(x, w_ih, w_hh, b_ih, b_hh)          # (B*N, T*H) lane-dense
    y = y2d.reshape(B, N, T, H)                           # [b, n, t, h]
    return jnp.transpose(y, (0, 3, 1, 2))                 # (B, C, N, T)


# --------------------------------- reference ---------------------------------

def _lstm_reference(x_seq, w_ih, w_hh, b_ih, b_hh):
    """Pure-JAX f32 reference LSTM (PyTorch gate order) via lax.scan."""
    H = w_hh.shape[1]
    wih_t = jnp.transpose(w_ih)
    whh_t = jnp.transpose(w_hh)
    bias = b_ih + b_hh

    def step(carry, x_t):
        h, c = carry
        g = x_t @ wih_t + h @ whh_t + bias
        i = jax.nn.sigmoid(g[:, 0 * H:1 * H])
        f = jax.nn.sigmoid(g[:, 1 * H:2 * H])
        gg = jnp.tanh(g[:, 2 * H:3 * H])
        o = jax.nn.sigmoid(g[:, 3 * H:4 * H])
        c_new = f * c + i * gg
        h_new = o * jnp.tanh(c_new)
        return (h_new, c_new), h_new

    BN = x_seq.shape[1]
    h0 = jnp.zeros((BN, H), jnp.float32)
    c0 = jnp.zeros((BN, H), jnp.float32)
    _, ys = lax.scan(step, (h0, c0), x_seq)
    return ys


if __name__ == "__main__":
    # Small shapes consistent with the module's forward:
    #   B=2 batch, C=in_dim=32, N=4 "nodes", T=8 time steps.
    B, C, N, T = 2, 32, 4, 8
    H = C  # LSTM hidden_size == in_dim

    key = jax.random.PRNGKey(0)
    k_x, k_wih, k_whh, k_bih, k_bhh = jax.random.split(key, 5)

    inp = jax.random.normal(k_x, (B, C, N, T), dtype=jnp.float32)

    # Deterministic PyTorch-style init: U(-1/sqrt(H), 1/sqrt(H)).
    bound = 1.0 / math.sqrt(H)
    w_ih = jax.random.uniform(k_wih, (4 * H, C), jnp.float32, -bound, bound)
    w_hh = jax.random.uniform(k_whh, (4 * H, H), jnp.float32, -bound, bound)
    b_ih = jax.random.uniform(k_bih, (4 * H,), jnp.float32, -bound, bound)
    b_hh = jax.random.uniform(k_bhh, (4 * H,), jnp.float32, -bound, bound)

    out = temporal_embedding_forward(inp, w_ih, w_hh, b_ih, b_hh)
    out = jax.block_until_ready(out)
    assert out.shape == (B, C, N, T), out.shape

    # Cross-check against a pure-JAX f32 reference.  The kernel uses bf16 MXU
    # operands (f32 accumulate), so tolerance is loosened accordingly.
    x_seq = jnp.transpose(inp, (3, 0, 2, 1)).reshape(T, B * N, C)
    ref = _lstm_reference(x_seq, w_ih, w_hh, b_ih, b_hh)
    ref = jnp.transpose(ref.reshape(T, B, N, C), (1, 3, 2, 0))
    assert jnp.allclose(out, ref, atol=3e-2, rtol=3e-2)

    print("KERNEL_OK")
</pallas_src>

<mosaic_0001>
module attributes {stable_mosaic.version = 11 : i64} {
  func.func @_lstm_fused_kernel(%arg0: i32, %arg1: memref<8x8x32xf32, #tpu.memory_space<vmem>>, %arg2: memref<32x128xbf16, #tpu.memory_space<vmem>>, %arg3: memref<32x128xbf16, #tpu.memory_space<vmem>>, %arg4: memref<1x128xf32, #tpu.memory_space<vmem>>, %arg5: memref<8x256xf32, #tpu.memory_space<vmem>>, %arg6: memref<8x8x128xf32, #tpu.memory_space<vmem>>, %arg7: memref<8x32xf32, #tpu.memory_space<vmem>>, %arg8: memref<8x32xf32, #tpu.memory_space<vmem>>) attributes {dimension_semantics = [#tpu.dimension_semantics<parallel>], iteration_bounds = array<i64: 1>, scalar_prefetch = 0 : i64, scratch_operands = 3 : i64, tpu.core_type = #tpu.core_type<tc>, window_params = [{transform_indices = @transform_0, window_bounds = array<i64: 8, 8, 32>}, {pipeline_mode = #tpu.pipeline_mode<synchronous>, transform_indices = @transform_1, window_bounds = array<i64: 32, 128>}, {pipeline_mode = #tpu.pipeline_mode<synchronous>, transform_indices = @transform_2, window_bounds = array<i64: 32, 128>}, {pipeline_mode = #tpu.pipeline_mode<synchronous>, transform_indices = @transform_3, window_bounds = array<i64: 1, 128>}, {transform_indices = @transform_4, window_bounds = array<i64: 8, 256>}]} {
    %c0 = arith.constant 0 : index
    %c0_0 = arith.constant 0 : index
    %0 = vector.load %arg4[%c0, %c0_0] : memref<1x128xf32, #tpu.memory_space<vmem>>, vector<1x128xf32>
    %c0_1 = arith.constant 0 : index
    %c0_2 = arith.constant 0 : index
    %1 = vector.load %arg2[%c0_1, %c0_2] : memref<32x128xbf16, #tpu.memory_space<vmem>>, vector<32x128xbf16>
    %c0_3 = arith.constant 0 : index
    %c0_4 = arith.constant 0 : index
    %2 = vector.load %arg3[%c0_3, %c0_4] : memref<32x128xbf16, #tpu.memory_space<vmem>>, vector<32x128xbf16>
    %c0_5 = arith.constant 0 : index
    %c0_6 = arith.constant 0 : index
    %c0_7 = arith.constant 0 : index
    %3 = vector.load %arg1[%c0_5, %c0_6, %c0_7] : memref<8x8x32xf32, #tpu.memory_space<vmem>>, vector<1x8x32xf32>
    %4 = vector.shape_cast %3 : vector<1x8x32xf32> to vector<8x32xf32>
    %5 = arith.truncf %4 : vector<8x32xf32> to vector<8x32xbf16>
    %cst = arith.constant dense<0.000000e+00> : vector<8x128xf32>
    %6 = tpu.matmul %5, %1, %cst {dimension_numbers = #tpu.dot_dimension_numbers<[1], [0], [0], [1], [0, 0, 1, 1], [], []>} : vector<8x32xbf16>, vector<32x128xbf16>, vector<8x128xf32> -> vector<8x128xf32>
    %7 = vector.broadcast %0 : vector<1x128xf32> to vector<8x128xf32>
    %8 = arith.addf %6, %7 : vector<8x128xf32>
    %c0_8 = arith.constant 0 : index
    %c0_9 = arith.constant 0 : index
    %c0_10 = arith.constant 0 : index
    %9 = vector.load %arg6[%c0_8, %c0_9, %c0_10] : memref<8x8x128xf32, #tpu.memory_space<vmem>>, vector<1x8x128xf32>
    %10 = vector.shape_cast %9 : vector<1x8x128xf32> to vector<8x128xf32>
    %11 = vector.shape_cast %8 : vector<8x128xf32> to vector<1x8x128xf32>
    tpu.vector_store %arg6[%c0_8, %c0_9, %c0_10], %11 {strides = array<i32>} : memref<8x8x128xf32, #tpu.memory_space<vmem>>, vector<1x8x128xf32>,
    %c1 = arith.constant 1 : index
    %c0_11 = arith.constant 0 : index
    %c0_12 = arith.constant 0 : index
    %12 = vector.load %arg1[%c1, %c0_11, %c0_12] : memref<8x8x32xf32, #tpu.memory_space<vmem>>, vector<1x8x32xf32>
    %13 = vector.shape_cast %12 : vector<1x8x32xf32> to vector<8x32xf32>
    %14 = arith.truncf %13 : vector<8x32xf32> to vector<8x32xbf16>
    %cst_13 = arith.constant dense<0.000000e+00> : vector<8x128xf32>
    %15 = tpu.matmul %14, %1, %cst_13 {dimension_numbers = #tpu.dot_dimension_numbers<[1], [0], [0], [1], [0, 0, 1, 1], [], []>} : vector<8x32xbf16>, vector<32x128xbf16>, vector<8x128xf32> -> vector<8x128xf32>
    %16 = vector.broadcast %0 : vector<1x128xf32> to vector<8x128xf32>
    %17 = arith.addf %15, %16 : vector<8x128xf32>
    %c1_14 = arith.constant 1 : index
    %c0_15 = arith.constant 0 : index
    %c0_16 = arith.constant 0 : index
    %18 = vector.load %arg6[%c1_14, %c0_15, %c0_16] : memref<8x8x128xf32, #tpu.memory_space<vmem>>, vector<1x8x128xf32>
    %19 = vector.shape_cast %18 : vector<1x8x128xf32> to vector<8x128xf32>
    %20 = vector.shape_cast %17 : vector<8x128xf32> to vector<1x8x128xf32>
    tpu.vector_store %arg6[%c1_14, %c0_15, %c0_16], %20 {strides = array<i32>} : memref<8x8x128xf32, #tpu.memory_space<vmem>>, vector<1x8x128xf32>,
    %c2 = arith.constant 2 : index
    %c0_17 = arith.constant 0 : index
    %c0_18 = arith.constant 0 : index
    %21 = vector.load %arg1[%c2, %c0_17, %c0_18] : memref<8x8x32xf32, #tpu.memory_space<vmem>>, vector<1x8x32xf32>
    %22 = vector.shape_cast %21 : vector<1x8x32xf32> to vector<8x32xf32>
    %23 = arith.truncf %22 : vector<8x32xf32> to vector<8x32xbf16>
    %cst_19 = arith.constant dense<0.000000e+00> : vector<8x128xf32>
    %24 = tpu.matmul %23, %1, %cst_19 {dimension_numbers = #tpu.dot_dimension_numbers<[1], [0], [0], [1], [0, 0, 1, 1], [], []>} : vector<8x32xbf16>, vector<32x128xbf16>, vector<8x128xf32> -> vector<8x128xf32>
    %25 = vector.broadcast %0 : vector<1x128xf32> to vector<8x128xf32>
    %26 = arith.addf %24, %25 : vector<8x128xf32>
    %c2_20 = arith.constant 2 : index
    %c0_21 = arith.constant 0 : index
    %c0_22 = arith.constant 0 : index
    %27 = vector.load %arg6[%c2_20, %c0_21, %c0_22] : memref<8x8x128xf32, #tpu.memory_space<vmem>>, vector<1x8x128xf32>
    %28 = vector.shape_cast %27 : vector<1x8x128xf32> to vector<8x128xf32>
    %29 = vector.shape_cast %26 : vector<8x128xf32> to vector<1x8x128xf32>
    tpu.vector_store %arg6[%c2_20, %c0_21, %c0_22], %29 {strides = array<i32>} : memref<8x8x128xf32, #tpu.memory_space<vmem>>, vector<1x8x128xf32>,
    %c3 = arith.constant 3 : index
    %c0_23 = arith.constant 0 : index
    %c0_24 = arith.constant 0 : index
    %30 = vector.load %arg1[%c3, %c0_23, %c0_24] : memref<8x8x32xf32, #tpu.memory_space<vmem>>, vector<1x8x32xf32>
    %31 = vector.shape_cast %30 : vector<1x8x32xf32> to vector<8x32xf32>
    %32 = arith.truncf %31 : vector<8x32xf32> to vector<8x32xbf16>
    %cst_25 = arith.constant dense<0.000000e+00> : vector<8x128xf32>
    %33 = tpu.matmul %32, %1, %cst_25 {dimension_numbers = #tpu.dot_dimension_numbers<[1], [0], [0], [1], [0, 0, 1, 1], [], []>} : vector<8x32xbf16>, vector<32x128xbf16>, vector<8x128xf32> -> vector<8x128xf32>
    %34 = vector.broadcast %0 : vector<1x128xf32> to vector<8x128xf32>
    %35 = arith.addf %33, %34 : vector<8x128xf32>
    %c3_26 = arith.constant 3 : index
    %c0_27 = arith.constant 0 : index
    %c0_28 = arith.constant 0 : index
    %36 = vector.load %arg6[%c3_26, %c0_27, %c0_28] : memref<8x8x128xf32, #tpu.memory_space<vmem>>, vector<1x8x128xf32>
    %37 = vector.shape_cast %36 : vector<1x8x128xf32> to vector<8x128xf32>
    %38 = vector.shape_cast %35 : vector<8x128xf32> to vector<1x8x128xf32>
    tpu.vector_store %arg6[%c3_26, %c0_27, %c0_28], %38 {strides = array<i32>} : memref<8x8x128xf32, #tpu.memory_space<vmem>>, vector<1x8x128xf32>,
    %c4 = arith.constant 4 : index
    %c0_29 = arith.constant 0 : index
    %c0_30 = arith.constant 0 : index
    %39 = vector.load %arg1[%c4, %c0_29, %c0_30] : memref<8x8x32xf32, #tpu.memory_space<vmem>>, vector<1x8x32xf32>
    %40 = vector.shape_cast %39 : vector<1x8x32xf32> to vector<8x32xf32>
    %41 = arith.truncf %40 : vector<8x32xf32> to vector<8x32xbf16>
    %cst_31 = arith.constant dense<0.000000e+00> : vector<8x128xf32>
    %42 = tpu.matmul %41, %1, %cst_31 {dimension_numbers = #tpu.dot_dimension_numbers<[1], [0], [0], [1], [0, 0, 1, 1], [], []>} : vector<8x32xbf16>, vector<32x128xbf16>, vector<8x128xf32> -> vector<8x128xf32>
    %43 = vector.broadcast %0 : vector<1x128xf32> to vector<8x128xf32>
    %44 = arith.addf %42, %43 : vector<8x128xf32>
    %c4_32 = arith.constant 4 : index
    %c0_33 = arith.constant 0 : index
    %c0_34 = arith.constant 0 : index
    %45 = vector.load %arg6[%c4_32, %c0_33, %c0_34] : memref<8x8x128xf32, #tpu.memory_space<vmem>>, vector<1x8x128xf32>
    %46 = vector.shape_cast %45 : vector<1x8x128xf32> to vector<8x128xf32>
    %47 = vector.shape_cast %44 : vector<8x128xf32> to vector<1x8x128xf32>
    tpu.vector_store %arg6[%c4_32, %c0_33, %c0_34], %47 {strides = array<i32>} : memref<8x8x128xf32, #tpu.memory_space<vmem>>, vector<1x8x128xf32>,
    %c5 = arith.constant 5 : index
    %c0_35 = arith.constant 0 : index
    %c0_36 = arith.constant 0 : index
    %48 = vector.load %arg1[%c5, %c0_35, %c0_36] : memref<8x8x32xf32, #tpu.memory_space<vmem>>, vector<1x8x32xf32>
    %49 = vector.shape_cast %48 : vector<1x8x32xf32> to vector<8x32xf32>
    %50 = arith.truncf %49 : vector<8x32xf32> to vector<8x32xbf16>
    %cst_37 = arith.constant dense<0.000000e+00> : vector<8x128xf32>
    %51 = tpu.matmul %50, %1, %cst_37 {dimension_numbers = #tpu.dot_dimension_numbers<[1], [0], [0], [1], [0, 0, 1, 1], [], []>} : vector<8x32xbf16>, vector<32x128xbf16>, vector<8x128xf32> -> vector<8x128xf32>
    %52 = vector.broadcast %0 : vector<1x128xf32> to vector<8x128xf32>
    %53 = arith.addf %51, %52 : vector<8x128xf32>
    %c5_38 = arith.constant 5 : index
    %c0_39 = arith.constant 0 : index
    %c0_40 = arith.constant 0 : index
    %54 = vector.load %arg6[%c5_38, %c0_39, %c0_40] : memref<8x8x128xf32, #tpu.memory_space<vmem>>, vector<1x8x128xf32>
    %55 = vector.shape_cast %54 : vector<1x8x128xf32> to vector<8x128xf32>
    %56 = vector.shape_cast %53 : vector<8x128xf32> to vector<1x8x128xf32>
    tpu.vector_store %arg6[%c5_38, %c0_39, %c0_40], %56 {strides = array<i32>} : memref<8x8x128xf32, #tpu.memory_space<vmem>>, vector<1x8x128xf32>,
    %c6 = arith.constant 6 : index
    %c0_41 = arith.constant 0 : index
    %c0_42 = arith.constant 0 : index
    %57 = vector.load %arg1[%c6, %c0_41, %c0_42] : memref<8x8x32xf32, #tpu.memory_space<vmem>>, vector<1x8x32xf32>
    %58 = vector.shape_cast %57 : vector<1x8x32xf32> to vector<8x32xf32>
    %59 = arith.truncf %58 : vector<8x32xf32> to vector<8x32xbf16>
    %cst_43 = arith.constant dense<0.000000e+00> : vector<8x128xf32>
    %60 = tpu.matmul %59, %1, %cst_43 {dimension_numbers = #tpu.dot_dimension_numbers<[1], [0], [0], [1], [0, 0, 1, 1], [], []>} : vector<8x32xbf16>, vector<32x128xbf16>, vector<8x128xf32> -> vector<8x128xf32>
    %61 = vector.broadcast %0 : vector<1x128xf32> to vector<8x128xf32>
    %62 = arith.addf %60, %61 : vector<8x128xf32>
    %c6_44 = arith.constant 6 : index
    %c0_45 = arith.constant 0 : index
    %c0_46 = arith.constant 0 : index
    %63 = vector.load %arg6[%c6_44, %c0_45, %c0_46] : memref<8x8x128xf32, #tpu.memory_space<vmem>>, vector<1x8x128xf32>
    %64 = vector.shape_cast %63 : vector<1x8x128xf32> to vector<8x128xf32>
    %65 = vector.shape_cast %62 : vector<8x128xf32> to vector<1x8x128xf32>
    tpu.vector_store %arg6[%c6_44, %c0_45, %c0_46], %65 {strides = array<i32>} : memref<8x8x128xf32, #tpu.memory_space<vmem>>, vector<1x8x128xf32>,
    %c7 = arith.constant 7 : index
    %c0_47 = arith.constant 0 : index
    %c0_48 = arith.constant 0 : index
    %66 = vector.load %arg1[%c7, %c0_47, %c0_48] : memref<8x8x32xf32, #tpu.memory_space<vmem>>, vector<1x8x32xf32>
    %67 = vector.shape_cast %66 : vector<1x8x32xf32> to vector<8x32xf32>
    %68 = arith.truncf %67 : vector<8x32xf32> to vector<8x32xbf16>
    %cst_49 = arith.constant dense<0.000000e+00> : vector<8x128xf32>
    %69 = tpu.matmul %68, %1, %cst_49 {dimension_numbers = #tpu.dot_dimension_numbers<[1], [0], [0], [1], [0, 0, 1, 1], [], []>} : vector<8x32xbf16>, vector<32x128xbf16>, vector<8x128xf32> -> vector<8x128xf32>
    %70 = vector.broadcast %0 : vector<1x128xf32> to vector<8x128xf32>
    %71 = arith.addf %69, %70 : vector<8x128xf32>
    %c7_50 = arith.constant 7 : index
    %c0_51 = arith.constant 0 : index
    %c0_52 = arith.constant 0 : index
    %72 = vector.load %arg6[%c7_50, %c0_51, %c0_52] : memref<8x8x128xf32, #tpu.memory_space<vmem>>, vector<1x8x128xf32>
    %73 = vector.shape_cast %72 : vector<1x8x128xf32> to vector<8x128xf32>
    %74 = vector.shape_cast %71 : vector<8x128xf32> to vector<1x8x128xf32>
    tpu.vector_store %arg6[%c7_50, %c0_51, %c0_52], %74 {strides = array<i32>} : memref<8x8x128xf32, #tpu.memory_space<vmem>>, vector<1x8x128xf32>,
    %cst_53 = arith.constant 0.000000e+00 : f32
    %75 = vector.broadcast %cst_53 : f32 to vector<8x32xf32>
    %c0_54 = arith.constant 0 : index
    %c0_55 = arith.constant 0 : index
    %76 = vector.load %arg7[%c0_54, %c0_55] : memref<8x32xf32, #tpu.memory_space<vmem>>, vector<8x32xf32>
    tpu.vector_store %arg7[%c0_54, %c0_55], %75 {strides = array<i32>} : memref<8x32xf32, #tpu.memory_space<vmem>>, vector<8x32xf32>,
    %cst_56 = arith.constant 0.000000e+00 : f32
    %77 = vector.broadcast %cst_56 : f32 to vector<8x32xf32>
    %c0_57 = arith.constant 0 : index
    %c0_58 = arith.constant 0 : index
    %78 = vector.load %arg8[%c0_57, %c0_58] : memref<8x32xf32, #tpu.memory_space<vmem>>, vector<8x32xf32>
    tpu.vector_store %arg8[%c0_57, %c0_58], %77 {strides = array<i32>} : memref<8x32xf32, #tpu.memory_space<vmem>>, vector<8x32xf32>,
    %c0_59 = arith.constant 0 : index
    %c0_60 = arith.constant 0 : index
    %c0_61 = arith.constant 0 : index
    %79 = vector.load %arg6[%c0_59, %c0_60, %c0_61] : memref<8x8x128xf32, #tpu.memory_space<vmem>>, vector<1x8x128xf32>
    %80 = vector.shape_cast %79 : vector<1x8x128xf32> to vector<8x128xf32>
    %c0_62 = arith.constant 0 : index
    %c0_63 = arith.constant 0 : index
    %81 = vector.load %arg7[%c0_62, %c0_63] : memref<8x32xf32, #tpu.memory_space<vmem>>, vector<8x32xf32>
    %82 = arith.truncf %81 : vector<8x32xf32> to vector<8x32xbf16>
    %cst_64 = arith.constant dense<0.000000e+00> : vector<8x128xf32>
    %83 = tpu.matmul %82, %2, %cst_64 {dimension_numbers = #tpu.dot_dimension_numbers<[1], [0], [0], [1], [0, 0, 1, 1], [], []>} : vector<8x32xbf16>, vector<32x128xbf16>, vector<8x128xf32> -> vector<8x128xf32>
    %84 = arith.addf %80, %83 : vector<8x128xf32>
    %85 = vector.extract_strided_slice %84 {offsets = [0, 0], sizes = [8, 32], strides = [1, 1]} : vector<8x128xf32> to vector<8x32xf32>
    %86 = arith.negf %85 : vector<8x32xf32>
    %87 = math.exp %86 : vector<8x32xf32>
    %cst_65 = arith.constant 1.000000e+00 : f32
    %88 = vector.broadcast %cst_65 : f32 to vector<8x32xf32>
    %89 = arith.addf %88, %87 : vector<8x32xf32>
    %90 = arith.divf %88, %89 : vector<8x32xf32>
    %91 = vector.extract_strided_slice %84 {offsets = [0, 32], sizes = [8, 32], strides = [1, 1]} : vector<8x128xf32> to vector<8x32xf32>
    %92 = arith.negf %91 : vector<8x32xf32>
    %93 = math.exp %92 : vector<8x32xf32>
    %cst_66 = arith.constant 1.000000e+00 : f32
    %94 = vector.broadcast %cst_66 : f32 to vector<8x32xf32>
    %95 = arith.addf %94, %93 : vector<8x32xf32>
    %96 = arith.divf %94, %95 : vector<8x32xf32>
    %97 = vector.extract_strided_slice %84 {offsets = [0, 64], sizes = [8, 32], strides = [1, 1]} : vector<8x128xf32> to vector<8x32xf32>
    %98 = math.tanh %97 : vector<8x32xf32>
    %99 = vector.extract_strided_slice %84 {offsets = [0, 96], sizes = [8, 32], strides = [1, 1]} : vector<8x128xf32> to vector<8x32xf32>
    %100 = arith.negf %99 : vector<8x32xf32>
    %101 = math.exp %100 : vector<8x32xf32>
    %cst_67 = arith.constant 1.000000e+00 : f32
    %102 = vector.broadcast %cst_67 : f32 to vector<8x32xf32>
    %103 = arith.addf %102, %101 : vector<8x32xf32>
    %104 = arith.divf %102, %103 : vector<8x32xf32>
    %c0_68 = arith.constant 0 : index
    %c0_69 = arith.constant 0 : index
    %105 = vector.load %arg8[%c0_68, %c0_69] : memref<8x32xf32, #tpu.memory_space<vmem>>, vector<8x32xf32>
    %106 = arith.mulf %96, %105 : vector<8x32xf32>
    %107 = arith.mulf %90, %98 : vector<8x32xf32>
    %108 = arith.addf %106, %107 : vector<8x32xf32>
    %109 = math.tanh %108 : vector<8x32xf32>
    %110 = arith.mulf %104, %109 : vector<8x32xf32>
    %c0_70 = arith.constant 0 : index
    %c0_71 = arith.constant 0 : index
    %111 = vector.load %arg8[%c0_70, %c0_71] : memref<8x32xf32, #tpu.memory_space<vmem>>, vector<8x32xf32>
    tpu.vector_store %arg8[%c0_70, %c0_71], %108 {strides = array<i32>} : memref<8x32xf32, #tpu.memory_space<vmem>>, vector<8x32xf32>,
    %c0_72 = arith.constant 0 : index
    %c0_73 = arith.constant 0 : index
    %112 = vector.load %arg7[%c0_72, %c0_73] : memref<8x32xf32, #tpu.memory_space<vmem>>, vector<8x32xf32>
    tpu.vector_store %arg7[%c0_72, %c0_73], %110 {strides = array<i32>} : memref<8x32xf32, #tpu.memory_space<vmem>>, vector<8x32xf32>,
    %c0_74 = arith.constant 0 : index
    %c0_75 = arith.constant 0 : index
    %113 = vector.load %arg5[%c0_74, %c0_75] : memref<8x256xf32, #tpu.memory_space<vmem>>, vector<8x32xf32>
    tpu.vector_store %arg5[%c0_74, %c0_75], %110 {strides = array<i32>} : memref<8x256xf32, #tpu.memory_space<vmem>>, vector<8x32xf32>,
    %c1_76 = arith.constant 1 : index
    %c0_77 = arith.constant 0 : index
    %c0_78 = arith.constant 0 : index
    %114 = vector.load %arg6[%c1_76, %c0_77, %c0_78] : memref<8x8x128xf32, #tpu.memory_space<vmem>>, vector<1x8x128xf32>
    %115 = vector.shape_cast %114 : vector<1x8x128xf32> to vector<8x128xf32>
    %c0_79 = arith.constant 0 : index
    %c0_80 = arith.constant 0 : index
    %116 = vector.load %arg7[%c0_79, %c0_80] : memref<8x32xf32, #tpu.memory_space<vmem>>, vector<8x32xf32>
    %117 = arith.truncf %116 : vector<8x32xf32> to vector<8x32xbf16>
    %cst_81 = arith.constant dense<0.000000e+00> : vector<8x128xf32>
    %118 = tpu.matmul %117, %2, %cst_81 {dimension_numbers = #tpu.dot_dimension_numbers<[1], [0], [0], [1], [0, 0, 1, 1], [], []>} : vector<8x32xbf16>, vector<32x128xbf16>, vector<8x128xf32> -> vector<8x128xf32>
    %119 = arith.addf %115, %118 : vector<8x128xf32>
    %120 = vector.extract_strided_slice %119 {offsets = [0, 0], sizes = [8, 32], strides = [1, 1]} : vector<8x128xf32> to vector<8x32xf32>
    %121 = arith.negf %120 : vector<8x32xf32>
    %122 = math.exp %121 : vector<8x32xf32>
    %cst_82 = arith.constant 1.000000e+00 : f32
    %123 = vector.broadcast %cst_82 : f32 to vector<8x32xf32>
    %124 = arith.addf %123, %122 : vector<8x32xf32>
    %125 = arith.divf %123, %124 : vector<8x32xf32>
    %126 = vector.extract_strided_slice %119 {offsets = [0, 32], sizes = [8, 32], strides = [1, 1]} : vector<8x128xf32> to vector<8x32xf32>
    %127 = arith.negf %126 : vector<8x32xf32>
    %128 = math.exp %127 : vector<8x32xf32>
    %cst_83 = arith.constant 1.000000e+00 : f32
    %129 = vector.broadcast %cst_83 : f32 to vector<8x32xf32>
    %130 = arith.addf %129, %128 : vector<8x32xf32>
    %131 = arith.divf %129, %130 : vector<8x32xf32>
    %132 = vector.extract_strided_slice %119 {offsets = [0, 64], sizes = [8, 32], strides = [1, 1]} : vector<8x128xf32> to vector<8x32xf32>
    %133 = math.tanh %132 : vector<8x32xf32>
    %134 = vector.extract_strided_slice %119 {offsets = [0, 96], sizes = [8, 32], strides = [1, 1]} : vector<8x128xf32> to vector<8x32xf32>
    %135 = arith.negf %134 : vector<8x32xf32>
    %136 = math.exp %135 : vector<8x32xf32>
    %cst_84 = arith.constant 1.000000e+00 : f32
    %137 = vector.broadcast %cst_84 : f32 to vector<8x32xf32>
    %138 = arith.addf %137, %136 : vector<8x32xf32>
    %139 = arith.divf %137, %138 : vector<8x32xf32>
    %c0_85 = arith.constant 0 : index
    %c0_86 = arith.constant 0 : index
    %140 = vector.load %arg8[%c0_85, %c0_86] : memref<8x32xf32, #tpu.memory_space<vmem>>, vector<8x32xf32>
    %141 = arith.mulf %131, %140 : vector<8x32xf32>
    %142 = arith.mulf %125, %133 : vector<8x32xf32>
    %143 = arith.addf %141, %142 : vector<8x32xf32>
    %144 = math.tanh %143 : vector<8x32xf32>
    %145 = arith.mulf %139, %144 : vector<8x32xf32>
    %c0_87 = arith.constant 0 : index
    %c0_88 = arith.constant 0 : index
    %146 = vector.load %arg8[%c0_87, %c0_88] : memref<8x32xf32, #tpu.memory_space<vmem>>, vector<8x32xf32>
    tpu.vector_store %arg8[%c0_87, %c0_88], %143 {strides = array<i32>} : memref<8x32xf32, #tpu.memory_space<vmem>>, vector<8x32xf32>,
    %c0_89 = arith.constant 0 : index
    %c0_90 = arith.constant 0 : index
    %147 = vector.load %arg7[%c0_89, %c0_90] : memref<8x32xf32, #tpu.memory_space<vmem>>, vector<8x32xf32>
    tpu.vector_store %arg7[%c0_89, %c0_90], %145 {strides = array<i32>} : memref<8x32xf32, #tpu.memory_space<vmem>>, vector<8x32xf32>,
    %c0_91 = arith.constant 0 : index
    %c32 = arith.constant 32 : index
    %148 = vector.load %arg5[%c0_91, %c32] : memref<8x256xf32, #tpu.memory_space<vmem>>, vector<8x32xf32>
    tpu.vector_store %arg5[%c0_91, %c32], %145 {strides = array<i32>} : memref<8x256xf32, #tpu.memory_space<vmem>>, vector<8x32xf32>,
    %c2_92 = arith.constant 2 : index
    %c0_93 = arith.constant 0 : index
    %c0_94 = arith.constant 0 : index
    %149 = vector.load %arg6[%c2_92, %c0_93, %c0_94] : memref<8x8x128xf32, #tpu.memory_space<vmem>>, vector<1x8x128xf32>
    %150 = vector.shape_cast %149 : vector<1x8x128xf32> to vector<8x128xf32>
    %c0_95 = arith.constant 0 : index
    %c0_96 = arith.constant 0 : index
    %151 = vector.load %arg7[%c0_95, %c0_96] : memref<8x32xf32, #tpu.memory_space<vmem>>, vector<8x32xf32>
    %152 = arith.truncf %151 : vector<8x32xf32> to vector<8x32xbf16>
    %cst_97 = arith.constant dense<0.000000e+00> : vector<8x128xf32>
    %153 = tpu.matmul %152, %2, %cst_97 {dimension_numbers = #tpu.dot_dimension_numbers<[1], [0], [0], [1], [0, 0, 1, 1], [], []>} : vector<8x32xbf16>, vector<32x128xbf16>, vector<8x128xf32> -> vector<8x128xf32>
    %154 = arith.addf %150, %153 : vector<8x128xf32>
    %155 = vector.extract_strided_slice %154 {offsets = [0, 0], sizes = [8, 32], strides = [1, 1]} : vector<8x128xf32> to vector<8x32xf32>
    %156 = arith.negf %155 : vector<8x32xf32>
    %157 = math.exp %156 : vector<8x32xf32>
    %cst_98 = arith.constant 1.000000e+00 : f32
    %158 = vector.broadcast %cst_98 : f32 to vector<8x32xf32>
    %159 = arith.addf %158, %157 : vector<8x32xf32>
    %160 = arith.divf %158, %159 : vector<8x32xf32>
    %161 = vector.extract_strided_slice %154 {offsets = [0, 32], sizes = [8, 32], strides = [1, 1]} : vector<8x128xf32> to vector<8x32xf32>
    %162 = arith.negf %161 : vector<8x32xf32>
    %163 = math.exp %162 : vector<8x32xf32>
    %cst_99 = arith.constant 1.000000e+00 : f32
    %164 = vector.broadcast %cst_99 : f32 to vector<8x32xf32>
    %165 = arith.addf %164, %163 : vector<8x32xf32>
    %166 = arith.divf %164, %165 : vector<8x32xf32>
    %167 = vector.extract_strided_slice %154 {offsets = [0, 64], sizes = [8, 32], strides = [1, 1]} : vector<8x128xf32> to vector<8x32xf32>
    %168 = math.tanh %167 : vector<8x32xf32>
    %169 = vector.extract_strided_slice %154 {offsets = [0, 96], sizes = [8, 32], strides = [1, 1]} : vector<8x128xf32> to vector<8x32xf32>
    %170 = arith.negf %169 : vector<8x32xf32>
    %171 = math.exp %170 : vector<8x32xf32>
    %cst_100 = arith.constant 1.000000e+00 : f32
    %172 = vector.broadcast %cst_100 : f32 to vector<8x32xf32>
    %173 = arith.addf %172, %171 : vector<8x32xf32>
    %174 = arith.divf %172, %173 : vector<8x32xf32>
    %c0_101 = arith.constant 0 : index
    %c0_102 = arith.constant 0 : index
    %175 = vector.load %arg8[%c0_101, %c0_102] : memref<8x32xf32, #tpu.memory_space<vmem>>, vector<8x32xf32>
    %176 = arith.mulf %166, %175 : vector<8x32xf32>
    %177 = arith.mulf %160, %168 : vector<8x32xf32>
    %178 = arith.addf %176, %177 : vector<8x32xf32>
    %179 = math.tanh %178 : vector<8x32xf32>
    %180 = arith.mulf %174, %179 : vector<8x32xf32>
    %c0_103 = arith.constant 0 : index
    %c0_104 = arith.constant 0 : index
    %181 = vector.load %arg8[%c0_103, %c0_104] : memref<8x32xf32, #tpu.memory_space<vmem>>, vector<8x32xf32>
    tpu.vector_store %arg8[%c0_103, %c0_104], %178 {strides = array<i32>} : memref<8x32xf32, #tpu.memory_space<vmem>>, vector<8x32xf32>,
    %c0_105 = arith.constant 0 : index
    %c0_106 = arith.constant 0 : index
    %182 = vector.load %arg7[%c0_105, %c0_106] : memref<8x32xf32, #tpu.memory_space<vmem>>, vector<8x32xf32>
    tpu.vector_store %arg7[%c0_105, %c0_106], %180 {strides = array<i32>} : memref<8x32xf32, #tpu.memory_space<vmem>>, vector<8x32xf32>,
    %c0_107 = arith.constant 0 : index
    %c64 = arith.constant 64 : index
    %183 = vector.load %arg5[%c0_107, %c64] : memref<8x256xf32, #tpu.memory_space<vmem>>, vector<8x32xf32>
    tpu.vector_store %arg5[%c0_107, %c64], %180 {strides = array<i32>} : memref<8x256xf32, #tpu.memory_space<vmem>>, vector<8x32xf32>,
    %c3_108 = arith.constant 3 : index
    %c0_109 = arith.constant 0 : index
    %c0_110 = arith.constant 0 : index
    %184 = vector.load %arg6[%c3_108, %c0_109, %c0_110] : memref<8x8x128xf32, #tpu.memory_space<vmem>>, vector<1x8x128xf32>
    %185 = vector.shape_cast %184 : vector<1x8x128xf32> to vector<8x128xf32>
    %c0_111 = arith.constant 0 : index
    %c0_112 = arith.constant 0 : index
    %186 = vector.load %arg7[%c0_111, %c0_112] : memref<8x32xf32, #tpu.memory_space<vmem>>, vector<8x32xf32>
    %187 = arith.truncf %186 : vector<8x32xf32> to vector<8x32xbf16>
    %cst_113 = arith.constant dense<0.000000e+00> : vector<8x128xf32>
    %188 = tpu.matmul %187, %2, %cst_113 {dimension_numbers = #tpu.dot_dimension_numbers<[1], [0], [0], [1], [0, 0, 1, 1], [], []>} : vector<8x32xbf16>, vector<32x128xbf16>, vector<8x128xf32> -> vector<8x128xf32>
    %189 = arith.addf %185, %188 : vector<8x128xf32>
    %190 = vector.extract_strided_slice %189 {offsets = [0, 0], sizes = [8, 32], strides = [1, 1]} : vector<8x128xf32> to vector<8x32xf32>
    %191 = arith.negf %190 : vector<8x32xf32>
    %192 = math.exp %191 : vector<8x32xf32>
    %cst_114 = arith.constant 1.000000e+00 : f32
    %193 = vector.broadcast %cst_114 : f32 to vector<8x32xf32>
    %194 = arith.addf %193, %192 : vector<8x32xf32>
    %195 = arith.divf %193, %194 : vector<8x32xf32>
    %196 = vector.extract_strided_slice %189 {offsets = [0, 32], sizes = [8, 32], strides = [1, 1]} : vector<8x128xf32> to vector<8x32xf32>
    %197 = arith.negf %196 : vector<8x32xf32>
    %198 = math.exp %197 : vector<8x32xf32>
    %cst_115 = arith.constant 1.000000e+00 : f32
    %199 = vector.broadcast %cst_115 : f32 to vector<8x32xf32>
    %200 = arith.addf %199, %198 : vector<8x32xf32>
    %201 = arith.divf %199, %200 : vector<8x32xf32>
    %202 = vector.extract_strided_slice %189 {offsets = [0, 64], sizes = [8, 32], strides = [1, 1]} : vector<8x128xf32> to vector<8x32xf32>
    %203 = math.tanh %202 : vector<8x32xf32>
    %204 = vector.extract_strided_slice %189 {offsets = [0, 96], sizes = [8, 32], strides = [1, 1]} : vector<8x128xf32> to vector<8x32xf32>
    %205 = arith.negf %204 : vector<8x32xf32>
    %206 = math.exp %205 : vector<8x32xf32>
    %cst_116 = arith.constant 1.000000e+00 : f32
    %207 = vector.broadcast %cst_116 : f32 to vector<8x32xf32>
    %208 = arith.addf %207, %206 : vector<8x32xf32>
    %209 = arith.divf %207, %208 : vector<8x32xf32>
    %c0_117 = arith.constant 0 : index
    %c0_118 = arith.constant 0 : index
    %210 = vector.load %arg8[%c0_117, %c0_118] : memref<8x32xf32, #tpu.memory_space<vmem>>, vector<8x32xf32>
    %211 = arith.mulf %201, %210 : vector<8x32xf32>
    %212 = arith.mulf %195, %203 : vector<8x32xf32>
    %213 = arith.addf %211, %212 : vector<8x32xf32>
    %214 = math.tanh %213 : vector<8x32xf32>
    %215 = arith.mulf %209, %214 : vector<8x32xf32>
    %c0_119 = arith.constant 0 : index
    %c0_120 = arith.constant 0 : index
    %216 = vector.load %arg8[%c0_119, %c0_120] : memref<8x32xf32, #tpu.memory_space<vmem>>, vector<8x32xf32>
    tpu.vector_store %arg8[%c0_119, %c0_120], %213 {strides = array<i32>} : memref<8x32xf32, #tpu.memory_space<vmem>>, vector<8x32xf32>,
    %c0_121 = arith.constant 0 : index
    %c0_122 = arith.constant 0 : index
    %217 = vector.load %arg7[%c0_121, %c0_122] : memref<8x32xf32, #tpu.memory_space<vmem>>, vector<8x32xf32>
    tpu.vector_store %arg7[%c0_121, %c0_122], %215 {strides = array<i32>} : memref<8x32xf32, #tpu.memory_space<vmem>>, vector<8x32xf32>,
    %c0_123 = arith.constant 0 : index
    %c96 = arith.constant 96 : index
    %218 = vector.load %arg5[%c0_123, %c96] : memref<8x256xf32, #tpu.memory_space<vmem>>, vector<8x32xf32>
    tpu.vector_store %arg5[%c0_123, %c96], %215 {strides = array<i32>} : memref<8x256xf32, #tpu.memory_space<vmem>>, vector<8x32xf32>,
    %c4_124 = arith.constant 4 : index
    %c0_125 = arith.constant 0 : index
    %c0_126 = arith.constant 0 : index
    %219 = vector.load %arg6[%c4_124, %c0_125, %c0_126] : memref<8x8x128xf32, #tpu.memory_space<vmem>>, vector<1x8x128xf32>
    %220 = vector.shape_cast %219 : vector<1x8x128xf32> to vector<8x128xf32>
    %c0_127 = arith.constant 0 : index
    %c0_128 = arith.constant 0 : index
    %221 = vector.load %arg7[%c0_127, %c0_128] : memref<8x32xf32, #tpu.memory_space<vmem>>, vector<8x32xf32>
    %222 = arith.truncf %221 : vector<8x32xf32> to vector<8x32xbf16>
    %cst_129 = arith.constant dense<0.000000e+00> : vector<8x128xf32>
    %223 = tpu.matmul %222, %2, %cst_129 {dimension_numbers = #tpu.dot_dimension_numbers<[1], [0], [0], [1], [0, 0, 1, 1], [], []>} : vector<8x32xbf16>, vector<32x128xbf16>, vector<8x128xf32> -> vector<8x128xf32>
    %224 = arith.addf %220, %223 : vector<8x128xf32>
    %225 = vector.extract_strided_slice %224 {offsets = [0, 0], sizes = [8, 32], strides = [1, 1]} : vector<8x128xf32> to vector<8x32xf32>
    %226 = arith.negf %225 : vector<8x32xf32>
    %227 = math.exp %226 : vector<8x32xf32>
    %cst_130 = arith.constant 1.000000e+00 : f32
    %228 = vector.broadcast %cst_130 : f32 to vector<8x32xf32>
    %229 = arith.addf %228, %227 : vector<8x32xf32>
    %230 = arith.divf %228, %229 : vector<8x32xf32>
    %231 = vector.extract_strided_slice %224 {offsets = [0, 32], sizes = [8, 32], strides = [1, 1]} : vector<8x128xf32> to vector<8x32xf32>
    %232 = arith.negf %231 : vector<8x32xf32>
    %233 = math.exp %232 : vector<8x32xf32>
    %cst_131 = arith.constant 1.000000e+00 : f32
    %234 = vector.broadcast %cst_131 : f32 to vector<8x32xf32>
    %235 = arith.addf %234, %233 : vector<8x32xf32>
    %236 = arith.divf %234, %235 : vector<8x32xf32>
    %237 = vector.extract_strided_slice %224 {offsets = [0, 64], sizes = [8, 32], strides = [1, 1]} : vector<8x128xf32> to vector<8x32xf32>
    %238 = math.tanh %237 : vector<8x32xf32>
    %239 = vector.extract_strided_slice %224 {offsets = [0, 96], sizes = [8, 32], strides = [1, 1]} : vector<8x128xf32> to vector<8x32xf32>
    %240 = arith.negf %239 : vector<8x32xf32>
    %241 = math.exp %240 : vector<8x32xf32>
    %cst_132 = arith.constant 1.000000e+00 : f32
    %242 = vector.broadcast %cst_132 : f32 to vector<8x32xf32>
    %243 = arith.addf %242, %241 : vector<8x32xf32>
    %244 = arith.divf %242, %243 : vector<8x32xf32>
    %c0_133 = arith.constant 0 : index
    %c0_134 = arith.constant 0 : index
    %245 = vector.load %arg8[%c0_133, %c0_134] : memref<8x32xf32, #tpu.memory_space<vmem>>, vector<8x32xf32>
    %246 = arith.mulf %236, %245 : vector<8x32xf32>
    %247 = arith.mulf %230, %238 : vector<8x32xf32>
    %248 = arith.addf %246, %247 : vector<8x32xf32>
    %249 = math.tanh %248 : vector<8x32xf32>
    %250 = arith.mulf %244, %249 : vector<8x32xf32>
    %c0_135 = arith.constant 0 : index
    %c0_136 = arith.constant 0 : index
    %251 = vector.load %arg8[%c0_135, %c0_136] : memref<8x32xf32, #tpu.memory_space<vmem>>, vector<8x32xf32>
    tpu.vector_store %arg8[%c0_135, %c0_136], %248 {strides = array<i32>} : memref<8x32xf32, #tpu.memory_space<vmem>>, vector<8x32xf32>,
    %c0_137 = arith.constant 0 : index
    %c0_138 = arith.constant 0 : index
    %252 = vector.load %arg7[%c0_137, %c0_138] : memref<8x32xf32, #tpu.memory_space<vmem>>, vector<8x32xf32>
    tpu.vector_store %arg7[%c0_137, %c0_138], %250 {strides = array<i32>} : memref<8x32xf32, #tpu.memory_space<vmem>>, vector<8x32xf32>,
    %c0_139 = arith.constant 0 : index
    %c128 = arith.constant 128 : index
    %253 = vector.load %arg5[%c0_139, %c128] : memref<8x256xf32, #tpu.memory_space<vmem>>, vector<8x32xf32>
    tpu.vector_store %arg5[%c0_139, %c128], %250 {strides = array<i32>} : memref<8x256xf32, #tpu.memory_space<vmem>>, vector<8x32xf32>,
    %c5_140 = arith.constant 5 : index
    %c0_141 = arith.constant 0 : index
    %c0_142 = arith.constant 0 : index
    %254 = vector.load %arg6[%c5_140, %c0_141, %c0_142] : memref<8x8x128xf32, #tpu.memory_space<vmem>>, vector<1x8x128xf32>
    %255 = vector.shape_cast %254 : vector<1x8x128xf32> to vector<8x128xf32>
    %c0_143 = arith.constant 0 : index
    %c0_144 = arith.constant 0 : index
    %256 = vector.load %arg7[%c0_143, %c0_144] : memref<8x32xf32, #tpu.memory_space<vmem>>, vector<8x32xf32>
    %257 = arith.truncf %256 : vector<8x32xf32> to vector<8x32xbf16>
    %cst_145 = arith.constant dense<0.000000e+00> : vector<8x128xf32>
    %258 = tpu.matmul %257, %2, %cst_145 {dimension_numbers = #tpu.dot_dimension_numbers<[1], [0], [0], [1], [0, 0, 1, 1], [], []>} : vector<8x32xbf16>, vector<32x128xbf16>, vector<8x128xf32> -> vector<8x128xf32>
    %259 = arith.addf %255, %258 : vector<8x128xf32>
    %260 = vector.extract_strided_slice %259 {offsets = [0, 0], sizes = [8, 32], strides = [1, 1]} : vector<8x128xf32> to vector<8x32xf32>
    %261 = arith.negf %260 : vector<8x32xf32>
    %262 = math.exp %261 : vector<8x32xf32>
    %cst_146 = arith.constant 1.000000e+00 : f32
    %263 = vector.broadcast %cst_146 : f32 to vector<8x32xf32>
    %264 = arith.addf %263, %262 : vector<8x32xf32>
    %265 = arith.divf %263, %264 : vector<8x32xf32>
    %266 = vector.extract_strided_slice %259 {offsets = [0, 32], sizes = [8, 32], strides = [1, 1]} : vector<8x128xf32> to vector<8x32xf32>
    %267 = arith.negf %266 : vector<8x32xf32>
    %268 = math.exp %267 : vector<8x32xf32>
    %cst_147 = arith.constant 1.000000e+00 : f32
    %269 = vector.broadcast %cst_147 : f32 to vector<8x32xf32>
    %270 = arith.addf %269, %268 : vector<8x32xf32>
    %271 = arith.divf %269, %270 : vector<8x32xf32>
    %272 = vector.extract_strided_slice %259 {offsets = [0, 64], sizes = [8, 32], strides = [1, 1]} : vector<8x128xf32> to vector<8x32xf32>
    %273 = math.tanh %272 : vector<8x32xf32>
    %274 = vector.extract_strided_slice %259 {offsets = [0, 96], sizes = [8, 32], strides = [1, 1]} : vector<8x128xf32> to vector<8x32xf32>
    %275 = arith.negf %274 : vector<8x32xf32>
    %276 = math.exp %275 : vector<8x32xf32>
    %cst_148 = arith.constant 1.000000e+00 : f32
    %277 = vector.broadcast %cst_148 : f32 to vector<8x32xf32>
    %278 = arith.addf %277, %276 : vector<8x32xf32>
    %279 = arith.divf %277, %278 : vector<8x32xf32>
    %c0_149 = arith.constant 0 : index
    %c0_150 = arith.constant 0 : index
    %280 = vector.load %arg8[%c0_149, %c0_150] : memref<8x32xf32, #tpu.memory_space<vmem>>, vector<8x32xf32>
    %281 = arith.mulf %271, %280 : vector<8x32xf32>
    %282 = arith.mulf %265, %273 : vector<8x32xf32>
    %283 = arith.addf %281, %282 : vector<8x32xf32>
    %284 = math.tanh %283 : vector<8x32xf32>
    %285 = arith.mulf %279, %284 : vector<8x32xf32>
    %c0_151 = arith.constant 0 : index
    %c0_152 = arith.constant 0 : index
    %286 = vector.load %arg8[%c0_151, %c0_152] : memref<8x32xf32, #tpu.memory_space<vmem>>, vector<8x32xf32>
    tpu.vector_store %arg8[%c0_151, %c0_152], %283 {strides = array<i32>} : memref<8x32xf32, #tpu.memory_space<vmem>>, vector<8x32xf32>,
    %c0_153 = arith.constant 0 : index
    %c0_154 = arith.constant 0 : index
    %287 = vector.load %arg7[%c0_153, %c0_154] : memref<8x32xf32, #tpu.memory_space<vmem>>, vector<8x32xf32>
    tpu.vector_store %arg7[%c0_153, %c0_154], %285 {strides = array<i32>} : memref<8x32xf32, #tpu.memory_space<vmem>>, vector<8x32xf32>,
    %c0_155 = arith.constant 0 : index
    %c160 = arith.constant 160 : index
    %288 = vector.load %arg5[%c0_155, %c160] : memref<8x256xf32, #tpu.memory_space<vmem>>, vector<8x32xf32>
    tpu.vector_store %arg5[%c0_155, %c160], %285 {strides = array<i32>} : memref<8x256xf32, #tpu.memory_space<vmem>>, vector<8x32xf32>,
    %c6_156 = arith.constant 6 : index
    %c0_157 = arith.constant 0 : index
    %c0_158 = arith.constant 0 : index
    %289 = vector.load %arg6[%c6_156, %c0_157, %c0_158] : memref<8x8x128xf32, #tpu.memory_space<vmem>>, vector<1x8x128xf32>
    %290 = vector.shape_cast %289 : vector<1x8x128xf32> to vector<8x128xf32>
    %c0_159 = arith.constant 0 : index
    %c0_160 = arith.constant 0 : index
    %291 = vector.load %arg7[%c0_159, %c0_160] : memref<8x32xf32, #tpu.memory_space<vmem>>, vector<8x32xf32>
    %292 = arith.truncf %291 : vector<8x32xf32> to vector<8x32xbf16>
    %cst_161 = arith.constant dense<0.000000e+00> : vector<8x128xf32>
    %293 = tpu.matmul %292, %2, %cst_161 {dimension_numbers = #tpu.dot_dimension_numbers<[1], [0], [0], [1], [0, 0, 1, 1], [], []>} : vector<8x32xbf16>, vector<32x128xbf16>, vector<8x128xf32> -> vector<8x128xf32>
    %294 = arith.addf %290, %293 : vector<8x128xf32>
    %295 = vector.extract_strided_slice %294 {offsets = [0, 0], sizes = [8, 32], strides = [1, 1]} : vector<8x128xf32> to vector<8x32xf32>
    %296 = arith.negf %295 : vector<8x32xf32>
    %297 = math.exp %296 : vector<8x32xf32>
    %cst_162 = arith.constant 1.000000e+00 : f32
    %298 = vector.broadcast %cst_162 : f32 to vector<8x32xf32>
    %299 = arith.addf %298, %297 : vector<8x32xf32>
    %300 = arith.divf %298, %299 : vector<8x32xf32>
    %301 = vector.extract_strided_slice %294 {offsets = [0, 32], sizes = [8, 32], strides = [1, 1]} : vector<8x128xf32> to vector<8x32xf32>
    %302 = arith.negf %301 : vector<8x32xf32>
    %303 = math.exp %302 : vector<8x32xf32>
    %cst_163 = arith.constant 1.000000e+00 : f32
    %304 = vector.broadcast %cst_163 : f32 to vector<8x32xf32>
    %305 = arith.addf %304, %303 : vector<8x32xf32>
    %306 = arith.divf %304, %305 : vector<8x32xf32>
    %307 = vector.extract_strided_slice %294 {offsets = [0, 64], sizes = [8, 32], strides = [1, 1]} : vector<8x128xf32> to vector<8x32xf32>
    %308 = math.tanh %307 : vector<8x32xf32>
    %309 = vector.extract_strided_slice %294 {offsets = [0, 96], sizes = [8, 32], strides = [1, 1]} : vector<8x128xf32> to vector<8x32xf32>
    %310 = arith.negf %309 : vector<8x32xf32>
    %311 = math.exp %310 : vector<8x32xf32>
    %cst_164 = arith.constant 1.000000e+00 : f32
    %312 = vector.broadcast %cst_164 : f32 to vector<8x32xf32>
    %313 = arith.addf %312, %311 : vector<8x32xf32>
    %314 = arith.divf %312, %313 : vector<8x32xf32>
    %c0_165 = arith.constant 0 : index
    %c0_166 = arith.constant 0 : index
    %315 = vector.load %arg8[%c0_165, %c0_166] : memref<8x32xf32, #tpu.memory_space<vmem>>, vector<8x32xf32>
    %316 = arith.mulf %306, %315 : vector<8x32xf32>
    %317 = arith.mulf %300, %308 : vector<8x32xf32>
    %318 = arith.addf %316, %317 : vector<8x32xf32>
    %319 = math.tanh %318 : vector<8x32xf32>
    %320 = arith.mulf %314, %319 : vector<8x32xf32>
    %c0_167 = arith.constant 0 : index
    %c0_168 = arith.constant 0 : index
    %321 = vector.load %arg8[%c0_167, %c0_168] : memref<8x32xf32, #tpu.memory_space<vmem>>, vector<8x32xf32>
    tpu.vector_store %arg8[%c0_167, %c0_168], %318 {strides = array<i32>} : memref<8x32xf32, #tpu.memory_space<vmem>>, vector<8x32xf32>,
    %c0_169 = arith.constant 0 : index
    %c0_170 = arith.constant 0 : index
    %322 = vector.load %arg7[%c0_169, %c0_170] : memref<8x32xf32, #tpu.memory_space<vmem>>, vector<8x32xf32>
    tpu.vector_store %arg7[%c0_169, %c0_170], %320 {strides = array<i32>} : memref<8x32xf32, #tpu.memory_space<vmem>>, vector<8x32xf32>,
    %c0_171 = arith.constant 0 : index
    %c192 = arith.constant 192 : index
    %323 = vector.load %arg5[%c0_171, %c192] : memref<8x256xf32, #tpu.memory_space<vmem>>, vector<8x32xf32>
    tpu.vector_store %arg5[%c0_171, %c192], %320 {strides = array<i32>} : memref<8x256xf32, #tpu.memory_space<vmem>>, vector<8x32xf32>,
    %c7_172 = arith.constant 7 : index
    %c0_173 = arith.constant 0 : index
    %c0_174 = arith.constant 0 : index
    %324 = vector.load %arg6[%c7_172, %c0_173, %c0_174] : memref<8x8x128xf32, #tpu.memory_space<vmem>>, vector<1x8x128xf32>
    %325 = vector.shape_cast %324 : vector<1x8x128xf32> to vector<8x128xf32>
    %c0_175 = arith.constant 0 : index
    %c0_176 = arith.constant 0 : index
    %326 = vector.load %arg7[%c0_175, %c0_176] : memref<8x32xf32, #tpu.memory_space<vmem>>, vector<8x32xf32>
    %327 = arith.truncf %326 : vector<8x32xf32> to vector<8x32xbf16>
    %cst_177 = arith.constant dense<0.000000e+00> : vector<8x128xf32>
    %328 = tpu.matmul %327, %2, %cst_177 {dimension_numbers = #tpu.dot_dimension_numbers<[1], [0], [0], [1], [0, 0, 1, 1], [], []>} : vector<8x32xbf16>, vector<32x128xbf16>, vector<8x128xf32> -> vector<8x128xf32>
    %329 = arith.addf %325, %328 : vector<8x128xf32>
    %330 = vector.extract_strided_slice %329 {offsets = [0, 0], sizes = [8, 32], strides = [1, 1]} : vector<8x128xf32> to vector<8x32xf32>
    %331 = arith.negf %330 : vector<8x32xf32>
    %332 = math.exp %331 : vector<8x32xf32>
    %cst_178 = arith.constant 1.000000e+00 : f32
    %333 = vector.broadcast %cst_178 : f32 to vector<8x32xf32>
    %334 = arith.addf %333, %332 : vector<8x32xf32>
    %335 = arith.divf %333, %334 : vector<8x32xf32>
    %336 = vector.extract_strided_slice %329 {offsets = [0, 32], sizes = [8, 32], strides = [1, 1]} : vector<8x128xf32> to vector<8x32xf32>
    %337 = arith.negf %336 : vector<8x32xf32>
    %338 = math.exp %337 : vector<8x32xf32>
    %cst_179 = arith.constant 1.000000e+00 : f32
    %339 = vector.broadcast %cst_179 : f32 to vector<8x32xf32>
    %340 = arith.addf %339, %338 : vector<8x32xf32>
    %341 = arith.divf %339, %340 : vector<8x32xf32>
    %342 = vector.extract_strided_slice %329 {offsets = [0, 64], sizes = [8, 32], strides = [1, 1]} : vector<8x128xf32> to vector<8x32xf32>
    %343 = math.tanh %342 : vector<8x32xf32>
    %344 = vector.extract_strided_slice %329 {offsets = [0, 96], sizes = [8, 32], strides = [1, 1]} : vector<8x128xf32> to vector<8x32xf32>
    %345 = arith.negf %344 : vector<8x32xf32>
    %346 = math.exp %345 : vector<8x32xf32>
    %cst_180 = arith.constant 1.000000e+00 : f32
    %347 = vector.broadcast %cst_180 : f32 to vector<8x32xf32>
    %348 = arith.addf %347, %346 : vector<8x32xf32>
    %349 = arith.divf %347, %348 : vector<8x32xf32>
    %c0_181 = arith.constant 0 : index
    %c0_182 = arith.constant 0 : index
    %350 = vector.load %arg8[%c0_181, %c0_182] : memref<8x32xf32, #tpu.memory_space<vmem>>, vector<8x32xf32>
    %351 = arith.mulf %341, %350 : vector<8x32xf32>
    %352 = arith.mulf %335, %343 : vector<8x32xf32>
    %353 = arith.addf %351, %352 : vector<8x32xf32>
    %354 = math.tanh %353 : vector<8x32xf32>
    %355 = arith.mulf %349, %354 : vector<8x32xf32>
    %c0_183 = arith.constant 0 : index
    %c0_184 = arith.constant 0 : index
    %356 = vector.load %arg8[%c0_183, %c0_184] : memref<8x32xf32, #tpu.memory_space<vmem>>, vector<8x32xf32>
    tpu.vector_store %arg8[%c0_183, %c0_184], %353 {strides = array<i32>} : memref<8x32xf32, #tpu.memory_space<vmem>>, vector<8x32xf32>,
    %c0_185 = arith.constant 0 : index
    %c0_186 = arith.constant 0 : index
    %357 = vector.load %arg7[%c0_185, %c0_186] : memref<8x32xf32, #tpu.memory_space<vmem>>, vector<8x32xf32>
    tpu.vector_store %arg7[%c0_185, %c0_186], %355 {strides = array<i32>} : memref<8x32xf32, #tpu.memory_space<vmem>>, vector<8x32xf32>,
    %c0_187 = arith.constant 0 : index
    %c224 = arith.constant 224 : index
    %358 = vector.load %arg5[%c0_187, %c224] : memref<8x256xf32, #tpu.memory_space<vmem>>, vector<8x32xf32>
    tpu.vector_store %arg5[%c0_187, %c224], %355 {strides = array<i32>} : memref<8x256xf32, #tpu.memory_space<vmem>>, vector<8x32xf32>,
    return
  }
  func.func @transform_0(%arg0: i32) -> (i32, i32, i32) {
    %c0_i32 = arith.constant 0 : i32
    %c0_i32_0 = arith.constant 0 : i32
    %c0_i32_1 = arith.constant 0 : i32
    return %c0_i32, %arg0, %c0_i32_0 : i32, i32, i32
  }
  func.func @transform_1(%arg0: i32) -> (i32, i32) {
    %c0_i32 = arith.constant 0 : i32
    %c0_i32_0 = arith.constant 0 : i32
    %c0_i32_1 = arith.constant 0 : i32
    return %c0_i32, %c0_i32_0 : i32, i32
  }
  func.func @transform_2(%arg0: i32) -> (i32, i32) {
    %c0_i32 = arith.constant 0 : i32
    %c0_i32_0 = arith.constant 0 : i32
    %c0_i32_1 = arith.constant 0 : i32
    return %c0_i32, %c0_i32_0 : i32, i32
  }
  func.func @transform_3(%arg0: i32) -> (i32, i32) {
    %c0_i32 = arith.constant 0 : i32
    %c0_i32_0 = arith.constant 0 : i32
    %c0_i32_1 = arith.constant 0 : i32
    return %c0_i32, %c0_i32_0 : i32, i32
  }
  func.func @transform_4(%arg0: i32) -> (i32, i32) {
    %c0_i32 = arith.constant 0 : i32
    %c0_i32_0 = arith.constant 0 : i32
    return %arg0, %c0_i32 : i32, i32
  }
}

</mosaic_0001>

<bundles_post_ra>
// kernel: tpu_custom_call.1
= control target key start
LH: loop header
LB: loop body
LE: loop exit
PB: predicated region body
PF: predicated region fallthrough
CT: control target
= control target key end

     0   :  { %9 = vsyncpa [#allocation6], 0  ;;  %s1882_s0 = inlined_call_operand.hbm [shape: f32[8,8,32], index: 0, kind: input, shape index: {}]   ;;  %s1883_s1 = inlined_call_operand.hbm [shape: bf16[32,128], index: 1, kind: input, shape index: {}]   ;;  %s1884_s2 = inlined_call_operand.hbm [shape: bf16[32,128], index: 2, kind: input, shape index: {}]   ;;  %s1885_s3 = inlined_call_operand.vmem [shape: f32[1,128], index: 3, kind: input, shape index: {}]   ;;  %s1886_s4 = inlined_call_operand.hbm [shape: f32[8,256], index: 4, kind: output, shape index: {}]  }
   0x1   :  { %10 = vsyncpa [#allocation9], 0 }
   0x2   :  { %11 = vsyncpa [#allocation7], 0  ;;  %s1582_s15 = smov [#allocation8]  }
   0x3   :  { %s29_s16 = sshll.u32 %s1582_s15, 4  ;;  %s30_s16 = int_to_ptr.vmem [resolvable:$true] %s29_s16 }
   0x4   :  { %s1504_s17 = scalar_lea.vmem %s30_s16, 256  ;;  %p1509_p1 = scmp.lt.s32.totalorder %s30_s16, %s30_s16 }
   0x5   :  { %p1505_p0 = scmp.ne.s32.totalorder %s30_s16, %s1504_s17  ;;  %p1510_p2 = scmp.lt.s32.totalorder %s1504_s17, %s1504_s17 }
   0x7   :  { %p1511_p3 = por %p1510_p2, %p1509_p1 }
   0x9   :  { %p1512_p4 = pnand %p1511_p3, %p1505_p0 }
   0xb   :  { %1515 = shalt.err (!%p1512_p4)
}
   0xc   :  { %s1583_s18 = smov 64   ;;  %s1584_s19 = smov 4  }
   0xd   :  { %35 = dma.hbm_to_vmem [thread:$0]  %s1883_s1, 256, %s30_s16, [#allocation9], %s1583_s18, %s1583_s18, %s1584_s19  }
   0xe   :  { %s1585_s22 = smov [#allocation5]  }
   0xf   :  { %s17_s23 = sshll.u32 %s1585_s22, 4  ;;  %s18_s23 = int_to_ptr.vmem [resolvable:$true] %s17_s23 }
  0x10   :  { %s1524_s24 = scalar_lea.vmem %s18_s23, 1024  ;;  %p1529_p6 = scmp.lt.s32.totalorder %s18_s23, %s18_s23 }
  0x11   :  { %p1525_p5 = scmp.ne.s32.totalorder %s18_s23, %s1524_s24  ;;  %p1530_p7 = scmp.lt.s32.totalorder %s1524_s24, %s1524_s24 }
  0x13   :  { %p1531_p8 = por %p1530_p7, %p1529_p6 }
  0x15   :  { %p1532_p9 = pnand %p1531_p8, %p1525_p5 }
  0x17   :  { %1535 = shalt.err (!%p1532_p9)
}
  0x18   :  { %s1586_s25 = smov 128   ;;  %s1587_s26 = smov 8  }
  0x19   :  { %23 = dma.hbm_to_vmem [thread:$0]  %s1882_s0, 1024, %s18_s23, [#allocation6], %s1586_s25, %s1586_s25, %s1587_s26  }
  0x1a   :  { %s1588_s29 = smov [#allocation10]  }
  0x1b   :  { %s41_s30 = sshll.u32 %s1588_s29, 4  ;;  %s42_s30 = int_to_ptr.vmem [resolvable:$true] %s41_s30 }
  0x1c   :  { %s1544_s1 = scalar_lea.vmem %s42_s30, 256  ;;  %p1549_p11 = scmp.lt.s32.totalorder %s42_s30, %s42_s30 }
  0x1d   :  { %p1545_p10 = scmp.ne.s32.totalorder %s42_s30, %s1544_s1  ;;  %p1550_p12 = scmp.lt.s32.totalorder %s1544_s1, %s1544_s1 }
  0x1f   :  { %p1551_p13 = por %p1550_p12, %p1549_p11 }
  0x21   :  { %p1552_p0 = pnand %p1551_p13, %p1545_p10 }
  0x23   :  { %1555 = shalt.err (!%p1552_p0)
}
  0x24   :  { %47 = dma.hbm_to_vmem [thread:$0]  %s1884_s2, 256, %s42_s30, [#allocation9], %s1583_s18, %s1583_s18, %s1584_s19  }
  0x25   :  { %1576 = dma.done.wait [#allocation6], 1024  }
  0x26   :  { %1577 = vsyncadd [#allocation6], 4294966272 }
  0x27   :  { %1578 = dma.done.wait [#allocation9], 512  }
  0x28   :  { %1579 = vsyncadd [#allocation9], 4294966784  ;;  %vm89_vm0 = vcmask 261120   ;;  %v1589_v0 = vmov 0.0   ;;  %vm1590_vm1 = vmmov 0   ;;  %v1642_v1 = vld [vmem:[#allocation8 + $0x8] sm:$0xff]  }
  0x29   :  { %1288 = vmatprep.subr.bf16.mxu0 %v1589_v0  ;;  %1292 = vmatprep.mubr.msk.bf16.mxu0 %vm1590_vm1, %v1589_v0  ;;  %470 = vst.msk [vmem:[#allocation3] sm:$0xff] %vm89_vm0, %v1589_v0  ;;  %471 = vst.msk [vmem:[#allocation4] sm:$0xff] %vm89_vm0, %v1589_v0  ;;  %v1645_v2 = vld [vmem:[#allocation8] sm:$0xff]   ;;  %v183_v5 = vld [vmem:[#allocation5 + $0x10] sm:$0xff]  ;;  %s1591_s7 = smov 32   ;;  %vm660_vm2 = vcmask 523520  }
  0x2a   :  { %1296 = vmatprep.subr.bf16.mxu1 %v1589_v0  ;;  %1300 = vmatprep.mubr.msk.bf16.mxu1 %vm1590_vm1, %v1589_v0  ;;  %v69_v3 = vld [vmem:[#allocation5] sm:$0xff]  ;;  %v184_v6 = vpack.c.bf16 %v183_v5, %v183_v5  ;;  %v375_v9 = vld [vmem:[#allocation5 + $0x30] sm:$0xff]  ;;  %v1674_v11 = vld [vmem:[#allocation10 + $0x8] sm:$0xff]   ;;  %vm751_vm3 = vcmask 785920   ;;  %vm839_vm4 = vcmask 1048320   ;;  %s1593_s8 = smov [#allocation11]  }
  0x2b   :  { %1289 = vmatpush3.bf16.msra.mxu0 %v1642_v1  ;;  %1297 = vmatpush3.bf16.msra.mxu1 %v1642_v1  ;;  %v70_v4 = vpack.c.bf16 %v69_v3, %v69_v3  ;;  %v279_v7 = vld [vmem:[#allocation5 + $0x20] sm:$0xff]  ;;  %v376_v10 = vpack.c.bf16 %v375_v9, %v375_v9  ;;  %v1679_v12 = vld [vmem:[#allocation10] sm:$0xff]   ;;  %v135_v51 = vld [vmem:[#allocation5 + $0x8] sm:$0xff]  ;;  %s1201_s9 = sshll.u32 %s1593_s8, 4  ;;  %s1202_s9 = int_to_ptr.vmem [resolvable:$true] %s1201_s9 }
  0x2c   :  { %1290 = vmatprep.subr.bf16.mxu0 %v1589_v0  ;;  %1298 = vmatprep.subr.bf16.mxu1 %v1589_v0  ;;  %v280_v8 = vpack.c.bf16 %v279_v7, %v279_v7  ;;  %v1702_v29 = vld [vmem:[%s1885_s3] ss:$0 sm:$0xff]  ;;  %v136_v52 = vpack.c.bf16 %v135_v51, %v135_v51  ;;  %v231_v53 = vld [vmem:[#allocation5 + $0x18] sm:$0xff]  ;;  %s1592_s3 = smov 96   ;;  %v327_v55 = vld [vmem:[#allocation5 + $0x28] sm:$0xff]  ;;  %s1556_s10 = scalar_lea.vmem %s1202_s9, 256 }
  0x2d   :  { %v232_v54 = vpack.c.bf16 %v231_v53, %v231_v53  ;;  %v328_v56 = vpack.c.bf16 %v327_v55, %v327_v55  ;;  %v423_v57 = vld [vmem:[#allocation5 + $0x38] sm:$0xff]  ;;  %p1557_p1 = scmp.ne.s32.totalorder %s1202_s9, %s1556_s10  ;;  %p1561_p2 = scmp.lt.s32.totalorder %s1202_s9, %s1202_s9 }
  0x2e   :  { %v424_v58 = vpack.c.bf16 %v423_v57, %v423_v57  ;;  %p1562_p3 = scmp.lt.s32.totalorder %s1556_s10, %s1556_s10 }
  0x2f   :  { %1291 = vmatpush3.bf16.msra.mxu0 %v1645_v2  ;;  %1299 = vmatpush3.bf16.msra.mxu1 %v1645_v2 }
  0x30   :  { %1304 = vmatprep.subr.bf16.mxu0 %v1589_v0  ;;  %1312 = vmatprep.subr.bf16.mxu1 %v1589_v0  ;;  %v473_v13 = vld [vmem:[#allocation3] sm:$0xff]  ;;  %v538_v39 = vld [vmem:[#allocation4] sm:$0xff]  ;;  %p1563_p4 = por %p1562_p3, %p1561_p2 }
  0x31   :  { %v474_v14 = vpack.c.bf16 %v473_v13, %v473_v13 }
  0x32   :  { %1293 = vmatmul.mubr.msk.bf16.vlgmr.msra.gmra.mxu0 %vm89_vm0, %v70_v4  ;;  %1301 = vmatmul.mubr.msk.bf16.vlgmr.msra.gmra.mxu1 %vm89_vm0, %v136_v52  ;;  %p1564_p5 = pnand %p1563_p4, %p1557_p1 }
  0x33   :  { %1305 = vmatpush3.bf16.msra.mxu0 %v1642_v1  ;;  %1308 = vmatprep.mubr.msk.bf16.mxu0 %vm1590_vm1, %v1589_v0 }
  0x34   :  { %1306 = vmatprep.subr.bf16.mxu0 %v1589_v0  ;;  %1313 = vmatpush3.bf16.msra.mxu1 %v1642_v1 }
  0x35   :  { %1316 = vmatprep.mubr.msk.bf16.mxu1 %vm1590_vm1, %v1589_v0  ;;  %1314 = vmatprep.subr.bf16.mxu1 %v1589_v0 }
  0x37   :  { %1307 = vmatpush3.bf16.msra.mxu0 %v1645_v2 }
  0x38   :  { %1320 = vmatprep.subr.bf16.mxu0 %v1589_v0  ;;  %1315 = vmatpush3.bf16.msra.mxu1 %v1645_v2 }
  0x39   :  { %1328 = vmatprep.subr.bf16.mxu1 %v1589_v0 }
  0x3a   :  { %1309 = vmatmul.mubr.msk.bf16.vlgmr.msra.gmra.mxu0 %vm89_vm0, %v184_v6 }
  0x3b   :  { %1321 = vmatpush3.bf16.msra.mxu0 %v1642_v1  ;;  %1324 = vmatprep.mubr.msk.bf16.mxu0 %vm1590_vm1, %v1589_v0 }
  0x3c   :  { %1322 = vmatprep.subr.bf16.mxu0 %v1589_v0  ;;  %1317 = vmatmul.mubr.msk.bf16.vlgmr.msra.gmra.mxu1 %vm89_vm0, %v232_v54 }
  0x3d   :  { %1329 = vmatpush3.bf16.msra.mxu1 %v1642_v1  ;;  %1332 = vmatprep.mubr.msk.bf16.mxu1 %vm1590_vm1, %v1589_v0 }
  0x3e   :  { %1330 = vmatprep.subr.bf16.mxu1 %v1589_v0 }
  0x3f   :  { %1323 = vmatpush3.bf16.msra.mxu0 %v1645_v2 }
  0x40   :  { %1336 = vmatprep.subr.bf16.mxu0 %v1589_v0 }
  0x41   :  { %1331 = vmatpush3.bf16.msra.mxu1 %v1645_v2 }
  0x42   :  { %1325 = vmatmul.mubr.msk.bf16.vlgmr.msra.gmra.mxu0 %vm89_vm0, %v280_v8  ;;  %1344 = vmatprep.subr.bf16.mxu1 %v1589_v0 }
  0x43   :  { %1337 = vmatpush3.bf16.msra.mxu0 %v1642_v1  ;;  %1340 = vmatprep.mubr.msk.bf16.mxu0 %vm1590_vm1, %v1589_v0 }
  0x44   :  { %1338 = vmatprep.subr.bf16.mxu0 %v1589_v0  ;;  %1333 = vmatmul.mubr.msk.bf16.vlgmr.msra.gmra.mxu1 %vm89_vm0, %v328_v56 }
  0x45   :  { %1345 = vmatpush3.bf16.msra.mxu1 %v1642_v1  ;;  %1348 = vmatprep.mubr.msk.bf16.mxu1 %vm1590_vm1, %v1589_v0 }
  0x46   :  { %1346 = vmatprep.subr.bf16.mxu1 %v1589_v0 }
  0x47   :  { %1339 = vmatpush3.bf16.msra.mxu0 %v1645_v2 }
  0x48   :  { %1352 = vmatprep.subr.bf16.mxu0 %v1589_v0 }
  0x49   :  { %1347 = vmatpush3.bf16.msra.mxu1 %v1645_v2 }
  0x4a   :  { %1341 = vmatmul.mubr.msk.bf16.vlgmr.msra.gmra.mxu0 %vm89_vm0, %v376_v10  ;;  %1360 = vmatprep.subr.bf16.mxu1 %v1589_v0 }
  0x4b   :  { %1353 = vmatpush3.bf16.msra.mxu0 %v1674_v11  ;;  %1356 = vmatprep.mubr.msk.bf16.mxu0 %vm1590_vm1, %v1589_v0 }
  0x4c   :  { %1354 = vmatprep.subr.bf16.mxu0 %v1589_v0  ;;  %1349 = vmatmul.mubr.msk.bf16.vlgmr.msra.gmra.mxu1 %vm89_vm0, %v424_v58 }
  0x4d   :  { %1361 = vmatpush3.bf16.msra.mxu1 %v1674_v11  ;;  %1364 = vmatprep.mubr.msk.bf16.mxu1 %vm1590_vm1, %v1589_v0 }
  0x4e   :  { %1362 = vmatprep.subr.bf16.mxu1 %v1589_v0 }
  0x4f   :  { %1355 = vmatpush3.bf16.msra.mxu0 %v1679_v12 }
  0x50   :  { %1368 = vmatprep.subr.bf16.mxu0 %v1589_v0 }
  0x51   :  { %1363 = vmatpush3.bf16.msra.mxu1 %v1679_v12 }
  0x52   :  { %1357 = vmatmul.mubr.msk.bf16.vlgmr.msra.gmra.mxu0 %vm89_vm0, %v474_v14  ;;  %1376 = vmatprep.subr.bf16.mxu1 %v1589_v0 }
  0x53   :  { %1369 = vmatpush3.bf16.msra.mxu0 %v1674_v11  ;;  %1372 = vmatprep.mubr.msk.bf16.mxu0 %vm1590_vm1, %v1589_v0 }
  0x54   :  { %1370 = vmatprep.subr.bf16.mxu0 %v1589_v0 }
  0x57   :  { %1371 = vmatpush3.bf16.msra.mxu0 %v1679_v12 }
  0x58   :  { %1384 = vmatprep.subr.bf16.mxu0 %v1589_v0 }
  0xf2   :  { %v127_v15 = vpop.f32.mrf.mxu0  ;;  %v174_v63 = vpop.f32.mrf.mxu1 }
  0xf3   :  { %v128_v32 = vadd.f32 %v1702_v29, %v127_v15 }
  0xf4   :  { %v1294_v16 = vpop.f32.mrf.mxu0  ;;  %v1302_v1 = vpop.f32.mrf.mxu1 }
  0xf6   :  { %v130_v17 = vpop.f32.mrf.mxu0  ;;  %v177_v2 = vpop.f32.mrf.mxu1 }
  0xf8   :  { %v1295_v18 = vpop.f32.mrf.mxu0  ;;  %v1303_v3 = vpop.f32.mrf.mxu1 }
  0xfa   :  { %v1693_v19 = vpop.f32.mrf.mxu0 }
  0xfc   :  { %v1310_v20 = vpop.f32.mrf.mxu0  ;;  %v1741_v4 = vpop.f32.mrf.mxu1 }
  0xfe   :  { %v225_v21 = vpop.f32.mrf.mxu0  ;;  %v1318_v5 = vpop.f32.mrf.mxu1 }
 0x100   :  { %v1311_v22 = vpop.f32.mrf.mxu0  ;;  %v273_v6 = vpop.f32.mrf.mxu1 }
 0x101   :  { %v175_v22 = vadd.f32 %v1702_v29, %v174_v63 }
 0x102   :  { %v1695_v23 = vpop.f32.mrf.mxu0  ;;  %v1319_v7 = vpop.f32.mrf.mxu1 }
 0x104   :  { %v1326_v24 = vpop.f32.mrf.mxu0  ;;  %v1743_v8 = vpop.f32.mrf.mxu1 }
 0x106   :  { %v321_v25 = vpop.f32.mrf.mxu0  ;;  %v1334_v9 = vpop.f32.mrf.mxu1 }
 0x108   :  { %v1327_v26 = vpop.f32.mrf.mxu0  ;;  %v369_v10 = vpop.f32.mrf.mxu1 }
 0x10a   :  { %v1697_v27 = vpop.f32.mrf.mxu0  ;;  %v1335_v13 = vpop.f32.mrf.mxu1 }
 0x10c   :  { %v1342_v28 = vpop.f32.mrf.mxu0  ;;  %v1745_v14 = vpop.f32.mrf.mxu1 }
 0x10e   :  { %v417_v30 = vpop.f32.mrf.mxu0  ;;  %v1350_v15 = vpop.f32.mrf.mxu1 }
 0x110   :  { %v1343_v31 = vpop.f32.mrf.mxu0  ;;  %v465_v16 = vpop.f32.mrf.mxu1 }
 0x111   :  { %v271_v16 = vadd.f32 %v1702_v29, %v1741_v4 }
 0x112   :  { %v524_v33 = vpop.f32.mrf.mxu0  ;;  %v1351_v17 = vpop.f32.mrf.mxu1 }
 0x113   :  { %v530_v34 = vadd.f32 %v524_v33, %v128_v32 }
 0x114   :  { %v1358_v35 = vpop.f32.mrf.mxu0 }
 0x115   :  { %1432 = vtanh.f32 %v530_v34  ;;  %v1225_v40 = vmul.f32 -1.442695, %v530_v34 }
 0x116   :  { %v527_v36 = vpop.f32.mrf.mxu0 }
 0x117   :  { %1434 = vpow2.f32 %v1225_v40 }
 0x118   :  { %v1359_v37 = vpop.f32.mrf.mxu0 }
 0x122   :  { %v1433_v38 = vpop.eup %1432 }
 0x123   :  { %545 = vrot.lane.b32.xlu0 %v1433_v38, %s1583_s18 }
 0x124   :  { %v1435_v41 = vpop.eup %1434 }
 0x125   :  { %v534_v42 = vadd.f32 1.0, %v1435_v41 }
 0x127   :  { %540 = vrot.lane.b32.xlu0 %v538_v39, %s1591_s7  ;;  %1436 = vrcp.f32 %v534_v42 }
 0x134   :  { %v1437_v43 = vpop.eup %1436 }
 0x195   :  { %v546_v44 = vpop.permute.xlu0 %545 }
 0x196   :  { %v548_v45 = vmul.f32 %v1437_v43, %v546_v44 }
 0x198   :  { %550 = vrot.lane.b32.xlu1 %v548_v45, %s1591_s7 }
 0x199   :  { %v541_v46 = vpop.permute.xlu0 %540 }
 0x19a   :  { %v543_v47 = vmul.f32 %v1437_v43, %v541_v46 }
 0x20a   :  { %v551_v48 = vpop.permute.xlu1 %550 }
 0x20b   :  { %v553_v49 = vadd.f32 %v551_v48, %v543_v47 }
 0x20d   :  { %1438 = vtanh.f32 %v553_v49 }
 0x21a   :  { %v1439_v50 = vpop.eup %1438 }
 0x21b   :  { %556 = vrot.lane.b32.xlu1 %v1439_v50, %s1583_s18  ;;  %v223_v50 = vadd.f32 %v1702_v29, %v1693_v19 }
 0x21f   :  { %561 = vrot.lane.b32.xlu1 %v553_v49, %s1592_s3 }
 0x28d   :  { %v557_v59 = vpop.permute.xlu1 %556 }
 0x28e   :  { %v559_v60 = vmul.f32 %v1437_v43, %v557_v59 }
 0x290   :  { %566 = vrot.lane.b32.xlu0 %v559_v60, %s1591_s7 }
 0x291   :  { %v562_v61 = vpop.permute.xlu1 %561 }
 0x292   :  { %564 = vst.msk [vmem:[#allocation4] sm:$0xff] %vm89_vm0, %v562_v61 }
 0x299   :  { %v625_v62 = vld [vmem:[#allocation4] sm:$0xff] }
 0x29a   :  { %627 = vrot.lane.b32.xlu1 %v625_v62, %s1591_s7 }
 0x302   :  { %v567_v18 = vpop.permute.xlu0 %566 }
 0x303   :  { %569 = vst.msk [vmem:[#allocation3] sm:$0xff] %vm89_vm0, %v567_v18  ;;  %570 = vst.msk [vmem:[#allocation11] sm:$0xff] %vm89_vm0, %v567_v18 }
 0x30a   :  { %v572_v20 = vld [vmem:[#allocation3] sm:$0xff] }
 0x30b   :  { %v573_v21 = vpack.c.bf16 %v572_v20, %v572_v20 }
 0x30c   :  { %v628_v38 = vpop.permute.xlu1 %627 }
 0x30d   :  { %1365 = vmatmul.mubr.msk.bf16.vlgmr.msra.gmra.mxu1 %vm89_vm0, %v573_v21 }
 0x30e   :  { %1377 = vmatpush3.bf16.msra.mxu1 %v1674_v11  ;;  %1380 = vmatprep.mubr.msk.bf16.mxu1 %vm1590_vm1, %v1589_v0 }
 0x30f   :  { %1378 = vmatprep.subr.bf16.mxu1 %v1589_v0 }
 0x312   :  { %1379 = vmatpush3.bf16.msra.mxu1 %v1679_v12 }
 0x313   :  { %1392 = vmatprep.subr.bf16.mxu1 %v1589_v0 }
 0x3cd   :  { %v611_v24 = vpop.f32.mrf.mxu1 }
 0x3ce   :  { %v617_v25 = vadd.f32 %v611_v24, %v175_v22 }
 0x3cf   :  { %v1366_v26 = vpop.f32.mrf.mxu1 }
 0x3d0   :  { %1440 = vtanh.f32 %v617_v25  ;;  %v1227_v32 = vmul.f32 -1.442695, %v617_v25 }
 0x3d1   :  { %v614_v28 = vpop.f32.mrf.mxu1 }
 0x3d2   :  { %1442 = vpow2.f32 %v1227_v32 }
 0x3d3   :  { %v1367_v30 = vpop.f32.mrf.mxu1 }
 0x3dd   :  { %v1441_v31 = vpop.eup %1440 }
 0x3de   :  { %632 = vrot.lane.b32.xlu0 %v1441_v31, %s1583_s18 }
 0x3df   :  { %v1443_v33 = vpop.eup %1442 }
 0x3e0   :  { %v621_v34 = vadd.f32 1.0, %v1443_v33 }
 0x3e2   :  { %1444 = vrcp.f32 %v621_v34 }
 0x3ef   :  { %v1445_v35 = vpop.eup %1444 }
 0x3f0   :  { %v630_v39 = vmul.f32 %v1445_v35, %v628_v38 }
 0x450   :  { %v633_v36 = vpop.permute.xlu0 %632 }
 0x451   :  { %v635_v37 = vmul.f32 %v1445_v35, %v633_v36 }
 0x453   :  { %637 = vrot.lane.b32.xlu0 %v635_v37, %s1591_s7 }
 0x4c5   :  { %v638_v40 = vpop.permute.xlu0 %637 }
 0x4c6   :  { %v640_v41 = vadd.f32 %v638_v40, %v630_v39 }
 0x4c8   :  { %1446 = vtanh.f32 %v640_v41 }
 0x4d5   :  { %v1447_v42 = vpop.eup %1446 }
 0x4d6   :  { %643 = vrot.lane.b32.xlu1 %v1447_v42, %s1583_s18 }
 0x4da   :  { %648 = vrot.lane.b32.xlu1 %v640_v41, %s1592_s3 }
 0x548   :  { %v644_v43 = vpop.permute.xlu1 %643 }
 0x549   :  { %v1761_v44 = vmul.f32 %v1445_v35, %v644_v43 }
 0x54b   :  { %653 = vrot.lane.b32.xlu0 %v1761_v44, %s1591_s7 }
 0x54c   :  { %v649_v45 = vpop.permute.xlu1 %648 }
 0x54d   :  { %651 = vst.msk [vmem:[#allocation4] sm:$0xff] %vm89_vm0, %v649_v45  ;;  %v319_v45 = vadd.f32 %v1702_v29, %v1695_v23 }
 0x554   :  { %v716_v46 = vld [vmem:[#allocation4] sm:$0xff] }
 0x555   :  { %718 = vrot.lane.b32.xlu1 %v716_v46, %s1591_s7 }
 0x5bd   :  { %v654_v47 = vpop.permute.xlu0 %653 }
 0x5be   :  { %656 = vst.msk [vmem:[#allocation3] sm:$0xff] %vm89_vm0, %v654_v47 }
 0x5c5   :  { %v663_v48 = vld [vmem:[#allocation3] sm:$0xff] }
 0x5c6   :  { %v664_v49 = vpack.c.bf16 %v663_v48, %v663_v48 }
 0x5c7   :  { %v719_v19 = vpop.permute.xlu1 %718 }
 0x5c8   :  { %1373 = vmatmul.mubr.msk.bf16.vlgmr.msra.gmra.mxu0 %vm89_vm0, %v664_v49 }
 0x5c9   :  { %1385 = vmatpush3.bf16.msra.mxu0 %v1674_v11  ;;  %1388 = vmatprep.mubr.msk.bf16.mxu0 %vm1590_vm1, %v1589_v0 }
 0x5ca   :  { %1386 = vmatprep.subr.bf16.mxu0 %v1589_v0 }
 0x5cd   :  { %1387 = vmatpush3.bf16.msra.mxu0 %v1679_v12 }
 0x5ce   :  { %1400 = vmatprep.subr.bf16.mxu0 %v1589_v0 }
 0x688   :  { %v702_v51 = vpop.f32.mrf.mxu0 }
 0x689   :  { %v708_v52 = vadd.f32 %v702_v51, %v223_v50 }
 0x68a   :  { %v1374_v53 = vpop.f32.mrf.mxu0 }
 0x68b   :  { %1448 = vtanh.f32 %v708_v52  ;;  %v1229_v57 = vmul.f32 -1.442695, %v708_v52 }
 0x68c   :  { %v705_v54 = vpop.f32.mrf.mxu0 }
 0x68d   :  { %1450 = vpow2.f32 %v1229_v57 }
 0x68e   :  { %v1375_v55 = vpop.f32.mrf.mxu0 }
 0x698   :  { %v1449_v56 = vpop.eup %1448 }
 0x699   :  { %723 = vrot.lane.b32.xlu0 %v1449_v56, %s1583_s18 }
 0x69a   :  { %v1451_v58 = vpop.eup %1450 }
 0x69b   :  { %v712_v59 = vadd.f32 1.0, %v1451_v58 }
 0x69d   :  { %1452 = vrcp.f32 %v712_v59 }
 0x6aa   :  { %v1453_v60 = vpop.eup %1452 }
 0x6ab   :  { %v721_v63 = vmul.f32 %v1453_v60, %v719_v19 }
 0x70b   :  { %v724_v61 = vpop.permute.xlu0 %723 }
 0x70c   :  { %v726_v62 = vmul.f32 %v1453_v60, %v724_v61 }
 0x70e   :  { %728 = vrot.lane.b32.xlu0 %v726_v62, %s1591_s7 }
 0x780   :  { %v729_v1 = vpop.permute.xlu0 %728 }
 0x781   :  { %v731_v2 = vadd.f32 %v729_v1, %v721_v63 }
 0x783   :  { %1454 = vtanh.f32 %v731_v2 }
 0x790   :  { %v1455_v3 = vpop.eup %1454 }
 0x791   :  { %734 = vrot.lane.b32.xlu1 %v1455_v3, %s1583_s18 }
 0x795   :  { %739 = vrot.lane.b32.xlu1 %v731_v2, %s1592_s3 }
 0x803   :  { %v735_v5 = vpop.permute.xlu1 %734 }
 0x804   :  { %v1781_v6 = vmul.f32 %v1453_v60, %v735_v5 }
 0x806   :  { %744 = vrot.lane.b32.xlu0 %v1781_v6, %s1591_s7 }
 0x807   :  { %v740_v7 = vpop.permute.xlu1 %739 }
 0x808   :  { %742 = vst.msk [vmem:[#allocation4] sm:$0xff] %vm89_vm0, %v740_v7  ;;  %v367_v7 = vadd.f32 %v1702_v29, %v1743_v8 }
 0x80f   :  { %v807_v9 = vld [vmem:[#allocation4] sm:$0xff] }
 0x810   :  { %809 = vrot.lane.b32.xlu1 %v807_v9, %s1591_s7 }
 0x878   :  { %v745_v10 = vpop.permute.xlu0 %744 }
 0x879   :  { %747 = vst.msk [vmem:[#allocation3] sm:$0xff] %vm89_vm0, %v745_v10 }
 0x880   :  { %v754_v13 = vld [vmem:[#allocation3] sm:$0xff] }
 0x881   :  { %v755_v15 = vpack.c.bf16 %v754_v13, %v754_v13 }
 0x882   :  { %v810_v4 = vpop.permute.xlu1 %809 }
 0x883   :  { %1381 = vmatmul.mubr.msk.bf16.vlgmr.msra.gmra.mxu1 %vm89_vm0, %v755_v15 }
 0x884   :  { %1393 = vmatpush3.bf16.msra.mxu1 %v1674_v11  ;;  %1396 = vmatprep.mubr.msk.bf16.mxu1 %vm1590_vm1, %v1589_v0 }
 0x885   :  { %1394 = vmatprep.subr.bf16.mxu1 %v1589_v0 }
 0x888   :  { %1395 = vmatpush3.bf16.msra.mxu1 %v1679_v12 }
 0x889   :  { %1408 = vmatprep.subr.bf16.mxu1 %v1589_v0 }
 0x943   :  { %v793_v17 = vpop.f32.mrf.mxu1 }
 0x944   :  { %v799_v18 = vadd.f32 %v793_v17, %v271_v16 }
 0x945   :  { %v1382_v20 = vpop.f32.mrf.mxu1 }
 0x946   :  { %1456 = vtanh.f32 %v799_v18  ;;  %v1231_v25 = vmul.f32 -1.442695, %v799_v18 }
 0x947   :  { %v796_v21 = vpop.f32.mrf.mxu1 }
 0x948   :  { %1458 = vpow2.f32 %v1231_v25 }
 0x949   :  { %v1383_v22 = vpop.f32.mrf.mxu1 }
 0x953   :  { %v1457_v24 = vpop.eup %1456 }
 0x954   :  { %814 = vrot.lane.b32.xlu0 %v1457_v24, %s1583_s18 }
 0x955   :  { %v1459_v26 = vpop.eup %1458 }
 0x956   :  { %v803_v28 = vadd.f32 1.0, %v1459_v26 }
 0x958   :  { %1460 = vrcp.f32 %v803_v28 }
 0x965   :  { %v1461_v30 = vpop.eup %1460 }
 0x966   :  { %v812_v33 = vmul.f32 %v1461_v30, %v810_v4 }
 0x9c6   :  { %v815_v31 = vpop.permute.xlu0 %814 }
 0x9c7   :  { %v817_v32 = vmul.f32 %v1461_v30, %v815_v31 }
 0x9c9   :  { %819 = vrot.lane.b32.xlu0 %v817_v32, %s1591_s7 }
 0xa3b   :  { %v820_v34 = vpop.permute.xlu0 %819 }
 0xa3c   :  { %v822_v35 = vadd.f32 %v820_v34, %v812_v33 }
 0xa3e   :  { %1462 = vtanh.f32 %v822_v35 }
 0xa4b   :  { %v1463_v36 = vpop.eup %1462 }
 0xa4c   :  { %825 = vrot.lane.b32.xlu1 %v1463_v36, %s1583_s18 }
 0xa50   :  { %830 = vrot.lane.b32.xlu1 %v822_v35, %s1592_s3  ;;  %v415_v35 = vadd.f32 %v1702_v29, %v1697_v27 }
 0xabe   :  { %v826_v37 = vpop.permute.xlu1 %825 }
 0xabf   :  { %v1801_v38 = vmul.f32 %v1461_v30, %v826_v37 }
 0xac1   :  { %835 = vrot.lane.b32.xlu0 %v1801_v38, %s1591_s7 }
 0xac2   :  { %v831_v39 = vpop.permute.xlu1 %830 }
 0xac3   :  { %833 = vst.msk [vmem:[#allocation4] sm:$0xff] %vm89_vm0, %v831_v39 }
 0xaca   :  { %v895_v40 = vld [vmem:[#allocation4] sm:$0xff] }
 0xacb   :  { %897 = vrot.lane.b32.xlu1 %v895_v40, %s1591_s7 }
 0xb33   :  { %v836_v41 = vpop.permute.xlu0 %835 }
 0xb34   :  { %838 = vst.msk [vmem:[#allocation3] sm:$0xff] %vm89_vm0, %v836_v41 }
 0xb3b   :  { %v842_v42 = vld [vmem:[#allocation3] sm:$0xff] }
 0xb3c   :  { %v843_v43 = vpack.c.bf16 %v842_v42, %v842_v42 }
 0xb3d   :  { %v898_v23 = vpop.permute.xlu1 %897 }
 0xb3e   :  { %1389 = vmatmul.mubr.msk.bf16.vlgmr.msra.gmra.mxu0 %vm89_vm0, %v843_v43 }
 0xb3f   :  { %1401 = vmatpush3.bf16.msra.mxu0 %v1674_v11  ;;  %1404 = vmatprep.mubr.msk.bf16.mxu0 %vm1590_vm1, %v1589_v0 }
 0xb40   :  { %1402 = vmatprep.subr.bf16.mxu0 %v1589_v0 }
 0xb43   :  { %1403 = vmatpush3.bf16.msra.mxu0 %v1679_v12 }
 0xbfe   :  { %v881_v46 = vpop.f32.mrf.mxu0 }
 0xbff   :  { %v887_v47 = vadd.f32 %v881_v46, %v319_v45 }
 0xc00   :  { %v1390_v48 = vpop.f32.mrf.mxu0 }
 0xc01   :  { %1464 = vtanh.f32 %v887_v47  ;;  %v1233_v52 = vmul.f32 -1.442695, %v887_v47 }
 0xc02   :  { %v884_v49 = vpop.f32.mrf.mxu0 }
 0xc03   :  { %1466 = vpow2.f32 %v1233_v52 }
 0xc04   :  { %v1391_v50 = vpop.f32.mrf.mxu0 }
 0xc0e   :  { %v1465_v51 = vpop.eup %1464 }
 0xc0f   :  { %902 = vrot.lane.b32.xlu0 %v1465_v51, %s1583_s18 }
 0xc10   :  { %v1467_v53 = vpop.eup %1466 }
 0xc11   :  { %v891_v54 = vadd.f32 1.0, %v1467_v53 }
 0xc13   :  { %1468 = vrcp.f32 %v891_v54 }
 0xc20   :  { %v1469_v55 = vpop.eup %1468 }
 0xc21   :  { %v900_v58 = vmul.f32 %v1469_v55, %v898_v23 }
 0xc81   :  { %v903_v56 = vpop.permute.xlu0 %902 }
 0xc82   :  { %v905_v57 = vmul.f32 %v1469_v55, %v903_v56 }
 0xc84   :  { %907 = vrot.lane.b32.xlu0 %v905_v57, %s1591_s7 }
 0xcf6   :  { %v908_v59 = vpop.permute.xlu0 %907 }
 0xcf7   :  { %v910_v60 = vadd.f32 %v908_v59, %v900_v58 }
 0xcf9   :  { %1470 = vtanh.f32 %v910_v60 }
 0xd06   :  { %v1471_v61 = vpop.eup %1470 }
 0xd07   :  { %913 = vrot.lane.b32.xlu1 %v1471_v61, %s1583_s18 }
 0xd0b   :  { %918 = vrot.lane.b32.xlu1 %v910_v60, %s1592_s3  ;;  %v463_v60 = vadd.f32 %v1702_v29, %v1745_v14 }
 0xd79   :  { %v914_v62 = vpop.permute.xlu1 %913 }
 0xd7a   :  { %v916_v19 = vmul.f32 %v1469_v55, %v914_v62 }
 0xd7c   :  { %923 = vrot.lane.b32.xlu0 %v916_v19, %s1591_s7 }
 0xd7d   :  { %v919_v63 = vpop.permute.xlu1 %918 }
 0xd7e   :  { %921 = vst.msk [vmem:[#allocation4] sm:$0xff] %vm89_vm0, %v919_v63 }
 0xd85   :  { %v982_v1 = vld [vmem:[#allocation4] sm:$0xff] }
 0xd86   :  { %984 = vrot.lane.b32.xlu1 %v982_v1, %s1591_s7 }
 0xdee   :  { %v924_v2 = vpop.permute.xlu0 %923 }
 0xdef   :  { %926 = vst.msk [vmem:[#allocation3] sm:$0xff] %vm89_vm0, %v924_v2  ;;  %927 = vst.msk [vmem:[#allocation11 + $0x8] sm:$0xff] %vm89_vm0, %v924_v2 }
 0xdf6   :  { %v929_v3 = vld [vmem:[#allocation3] sm:$0xff] }
 0xdf7   :  { %v930_v5 = vpack.c.bf16 %v929_v3, %v929_v3 }
 0xdf8   :  { %v985_v8 = vpop.permute.xlu1 %984 }
 0xdf9   :  { %1397 = vmatmul.mubr.msk.bf16.vlgmr.msra.gmra.mxu1 %vm89_vm0, %v930_v5 }
 0xdfa   :  { %1409 = vmatpush3.bf16.msra.mxu1 %v1674_v11  ;;  %1412 = vmatprep.mubr.msk.bf16.mxu1 %vm1590_vm1, %v1589_v0 }
 0xdfb   :  { %1410 = vmatprep.subr.bf16.mxu1 %v1589_v0 }
 0xdfe   :  { %1411 = vmatpush3.bf16.msra.mxu1 %v1679_v12 }
 0xeb9   :  { %v968_v9 = vpop.f32.mrf.mxu1 }
 0xeba   :  { %v974_v10 = vadd.f32 %v968_v9, %v367_v7 }
 0xebb   :  { %v1398_v13 = vpop.f32.mrf.mxu1 }
 0xebc   :  { %1472 = vtanh.f32 %v974_v10  ;;  %v1235_v11 = vmul.f32 -1.442695, %v974_v10 }
 0xebd   :  { %v971_v15 = vpop.f32.mrf.mxu1 }
 0xebe   :  { %1474 = vpow2.f32 %v1235_v11 }
 0xebf   :  { %v1399_v16 = vpop.f32.mrf.mxu1 }
 0xec9   :  { %v1473_v17 = vpop.eup %1472 }
 0xeca   :  { %989 = vrot.lane.b32.xlu0 %v1473_v17, %s1583_s18 }
 0xecb   :  { %v1475_v18 = vpop.eup %1474 }
 0xecc   :  { %v978_v20 = vadd.f32 1.0, %v1475_v18 }
 0xece   :  { %1476 = vrcp.f32 %v978_v20 }
 0xedb   :  { %v1477_v0 = vpop.eup %1476 }
 0xedc   :  { %v987_v22 = vmul.f32 %v1477_v0, %v985_v8 }
 0xf3c   :  { %v990_v21 = vpop.permute.xlu0 %989 }
 0xf3d   :  { %v992_v12 = vmul.f32 %v1477_v0, %v990_v21 }
 0xf3f   :  { %994 = vrot.lane.b32.xlu0 %v992_v12, %s1591_s7 }
 0xfb1   :  { %v995_v24 = vpop.permute.xlu0 %994 }
 0xfb2   :  { %v997_v25 = vadd.f32 %v995_v24, %v987_v22 }
 0xfb4   :  { %1478 = vtanh.f32 %v997_v25 }
 0xfc1   :  { %v1479_v26 = vpop.eup %1478 }
 0xfc2   :  { %1000 = vrot.lane.b32.xlu1 %v1479_v26, %s1583_s18 }
 0xfc6   :  { %1005 = vrot.lane.b32.xlu1 %v997_v25, %s1592_s3 }
0x1034   :  { %v1001_v28 = vpop.permute.xlu1 %1000 }
0x1035   :  { %v1837_v30 = vmul.f32 %v1477_v0, %v1001_v28 }
0x1037   :  { %1010 = vrot.lane.b32.xlu0 %v1837_v30, %s1591_s7 }
0x1038   :  { %v1006_v31 = vpop.permute.xlu1 %1005 }
0x1039   :  { %1008 = vst.msk [vmem:[#allocation4] sm:$0xff] %vm89_vm0, %v1006_v31 }
0x1040   :  { %v1072_v32 = vld [vmem:[#allocation4] sm:$0xff] }
0x1041   :  { %1074 = vrot.lane.b32.xlu1 %v1072_v32, %s1591_s7 }
0x10a9   :  { %v1011_v4 = vpop.permute.xlu0 %1010 }
0x10aa   :  { %1013 = vst.msk [vmem:[#allocation3] sm:$0xff] %vm89_vm0, %v1011_v4 }
0x10b1   :  { %v1019_v33 = vld [vmem:[#allocation3] sm:$0xff] }
0x10b2   :  { %v1020_v34 = vpack.c.bf16 %v1019_v33, %v1019_v33 }
0x10b3   :  { %v1075_v27 = vpop.permute.xlu1 %1074 }
0x10b4   :  { %1405 = vmatmul.mubr.msk.bf16.vlgmr.msra.gmra.mxu0 %vm89_vm0, %v1020_v34 }
0x1174   :  { %v1058_v36 = vpop.f32.mrf.mxu0 }
0x1175   :  { %v1064_v37 = vadd.f32 %v1058_v36, %v415_v35 }
0x1176   :  { %v1406_v39 = vpop.f32.mrf.mxu0 }
0x1177   :  { %1480 = vtanh.f32 %v1064_v37  ;;  %v1237_v43 = vmul.f32 -1.442695, %v1064_v37 }
0x1178   :  { %v1061_v40 = vpop.f32.mrf.mxu0 }
0x1179   :  { %1482 = vpow2.f32 %v1237_v43 }
0x117a   :  { %v1407_v41 = vpop.f32.mrf.mxu0 }
0x1184   :  { %v1481_v42 = vpop.eup %1480 }
0x1185   :  { %1079 = vrot.lane.b32.xlu0 %v1481_v42, %s1583_s18 }
0x1186   :  { %v1483_v45 = vpop.eup %1482 }
0x1187   :  { %v1068_v46 = vadd.f32 1.0, %v1483_v45 }
0x1189   :  { %1484 = vrcp.f32 %v1068_v46 }
0x1196   :  { %v1485_v47 = vpop.eup %1484 }
0x1197   :  { %v1077_v50 = vmul.f32 %v1485_v47, %v1075_v27 }
0x11f7   :  { %v1080_v48 = vpop.permute.xlu0 %1079 }
0x11f8   :  { %v1082_v49 = vmul.f32 %v1485_v47, %v1080_v48 }
0x11fa   :  { %1084 = vrot.lane.b32.xlu0 %v1082_v49, %s1591_s7 }
0x126c   :  { %v1085_v51 = vpop.permute.xlu0 %1084 }
0x126d   :  { %v1087_v52 = vadd.f32 %v1085_v51, %v1077_v50 }
0x126f   :  { %1486 = vtanh.f32 %v1087_v52 }
0x127c   :  { %v1487_v53 = vpop.eup %1486 }
0x127d   :  { %1090 = vrot.lane.b32.xlu1 %v1487_v53, %s1583_s18 }
0x1281   :  { %1095 = vrot.lane.b32.xlu1 %v1087_v52, %s1592_s3 }
0x12ef   :  { %v1091_v54 = vpop.permute.xlu1 %1090 }
0x12f0   :  { %v1093_v55 = vmul.f32 %v1485_v47, %v1091_v54 }
0x12f2   :  { %1100 = vrot.lane.b32.xlu0 %v1093_v55, %s1591_s7 }
0x12f3   :  { %v1096_v56 = vpop.permute.xlu1 %1095 }
0x12f4   :  { %1098 = vst.msk [vmem:[#allocation4] sm:$0xff] %vm89_vm0, %v1096_v56 }
0x12fb   :  { %v1162_v57 = vld [vmem:[#allocation4] sm:$0xff] }
0x12fc   :  { %1164 = vrot.lane.b32.xlu1 %v1162_v57, %s1591_s7 }
0x1364   :  { %v1101_v23 = vpop.permute.xlu0 %1100 }
0x1365   :  { %1103 = vst.msk [vmem:[#allocation3] sm:$0xff] %vm89_vm0, %v1101_v23 }
0x136c   :  { %v1109_v58 = vld [vmem:[#allocation3] sm:$0xff] }
0x136d   :  { %v1110_v59 = vpack.c.bf16 %v1109_v58, %v1109_v58 }
0x136e   :  { %v1165_v29 = vpop.permute.xlu1 %1164 }
0x136f   :  { %1413 = vmatmul.mubr.msk.bf16.vlgmr.msra.gmra.mxu1 %vm89_vm0, %v1110_v59 }
0x142f   :  { %v1148_v61 = vpop.f32.mrf.mxu1 }
0x1430   :  { %v1154_v62 = vadd.f32 %v1148_v61, %v463_v60 }
0x1431   :  { %v1414_v19 = vpop.f32.mrf.mxu1 }
0x1432   :  { %1488 = vtanh.f32 %v1154_v62  ;;  %v1239_v3 = vmul.f32 -1.442695, %v1154_v62 }
0x1433   :  { %v1151_v63 = vpop.f32.mrf.mxu1 }
0x1434   :  { %1490 = vpow2.f32 %v1239_v3 }
0x1435   :  { %v1415_v1 = vpop.f32.mrf.mxu1 }
0x143f   :  { %v1489_v2 = vpop.eup %1488 }
0x1440   :  { %1169 = vrot.lane.b32.xlu0 %v1489_v2, %s1583_s18 }
0x1441   :  { %v1491_v5 = vpop.eup %1490 }
0x1442   :  { %v1158_v7 = vadd.f32 1.0, %v1491_v5 }
0x1444   :  { %1492 = vrcp.f32 %v1158_v7 }
0x1451   :  { %v1493_v9 = vpop.eup %1492 }
0x1452   :  { %v1167_v14 = vmul.f32 %v1493_v9, %v1165_v29 }
0x14b2   :  { %v1170_v10 = vpop.permute.xlu0 %1169 }
0x14b3   :  { %v1172_v13 = vmul.f32 %v1493_v9, %v1170_v10 }
0x14b5   :  { %1174 = vrot.lane.b32.xlu0 %v1172_v13, %s1591_s7 }
0x14b9   :  { %657 = vrot.lane.b32.xlu0 %v1761_v44, %s1583_s18 }
0x14bd   :  { %748 = vrot.lane.b32.xlu0 %v1781_v6, %s1592_s3 }
0x1527   :  { %v1175_v15 = vpop.permute.xlu0 %1174 }
0x1528   :  { %v1177_v16 = vadd.f32 %v1175_v15, %v1167_v14 }
0x152a   :  { %1494 = vtanh.f32 %v1177_v16  ;;  %1185 = vrot.lane.b32.xlu0 %v1177_v16, %s1592_s3 }
0x152b   :  { %v658_v17 = vpop.permute.xlu0 %657 }
0x152c   :  { %661 = vst.msk [vmem:[#allocation11] sm:$0xff] %vm660_vm2, %v658_v17 }
0x152f   :  { %v749_v11 = vpop.permute.xlu0 %748 }
0x1530   :  { %752 = vst.msk [vmem:[#allocation11] sm:$0xff] %vm751_vm3, %v749_v11 }
0x1531   :  { %840 = vst.msk [vmem:[#allocation11] sm:$0xff] %vm839_vm4, %v1801_v38 }
0x1537   :  { %v1495_v44 = vpop.eup %1494 }
0x1538   :  { %1180 = vrot.lane.b32.xlu1 %v1495_v44, %s1583_s18 }
0x153c   :  { %1014 = vrot.lane.b32.xlu1 %v1837_v30, %s1583_s18 }
0x1540   :  { %1104 = vrot.lane.b32.xlu1 %v1093_v55, %s1592_s3 }
0x159c   :  { %v1186_v6 = vpop.permute.xlu0 %1185 }
0x159d   :  { %1188 = vst.msk [vmem:[#allocation4] sm:$0xff] %vm89_vm0, %v1186_v6 }
0x15aa   :  { %v1181_v18 = vpop.permute.xlu1 %1180 }
0x15ab   :  { %v1183_v20 = vmul.f32 %v1493_v9, %v1181_v18 }
0x15ad   :  { %1190 = vrot.lane.b32.xlu1 %v1183_v20, %s1591_s7 }
0x15ae   :  { %v1015_v0 = vpop.permute.xlu1 %1014 }
0x15af   :  { %1017 = vst.msk [vmem:[#allocation11 + $0x8] sm:$0xff] %vm660_vm2, %v1015_v0 }
0x15b2   :  { %v1105_v38 = vpop.permute.xlu1 %1104 }
0x15b3   :  { %1107 = vst.msk [vmem:[#allocation11 + $0x8] sm:$0xff] %vm751_vm3, %v1105_v38 }
0x15b4   :  { %1194 = vst.msk [vmem:[#allocation11 + $0x8] sm:$0xff] %vm839_vm4, %v1183_v20 }
0x15b5   :  { %1567 = shalt.err (!%p1564_p5)
}
0x15b6   :  { %1204 = dma.vmem_to_hbm [thread:$0]  %s1202_s9, 256, %s1886_s4, [#allocation7]  }
0x161f   :  { %v1191_v21 = vpop.permute.xlu1 %1190 }
0x1620   :  { %1193 = vst.msk [vmem:[#allocation3] sm:$0xff] %vm89_vm0, %v1191_v21 }
0x1621   :  { %1580 = dma.done.wait [#allocation7], 256  }
0x1622   :  { %1581 = vsyncadd [#allocation7], 4294967040 }
0x1623   :  { %1208 = vsyncpa [#allocation6], 1 }
0x1624   :  { %1209 = vsyncpa [#allocation9], 1 }
0x1625   :  { %1210 = vsyncpa [#allocation7], 1 }

</bundles_post_ra>
